<compile_context>
chip_gen: v7x
topology: tpu7x:2x2x1
jax: 0.10.0
libtpu: 0.0.40
codegen_flags: <defaults>
</compile_context>

<pallas_src>
import functools

import jax
import jax.numpy as jnp
from jax import lax
from jax.experimental import pallas as pl
from jax.experimental.pallas import tpu as pltpu


_VMEM = pl.BlockSpec(memory_space=pltpu.MemorySpace.VMEM)


# ---------------------------------------------------------------------------
# Fused encoder kernel (all LSTM layers + linear head)
# ---------------------------------------------------------------------------
def _make_encoder_kernel(num_layers, seq_len, batch_padded, hidden):
    T, Bp, H, L = seq_len, batch_padded, hidden, num_layers
    unroll = True if T <= 16 else 8        # full unroll only for small T

    def kernel(*refs):
        # ---- unpack refs -------------------------------------------------
        x_ref, h0_ref, c0_ref = refs[0:3]                  # (T*Bp,Din),(L,Bp,H),(L,Bp,H)
        w_refs = refs[3:3 + 3 * L]                         # per layer: wih_t, whh_t, b
        wlin_ref, blin_ref = refs[3 + 3 * L:5 + 3 * L]     # (1,H), (1,1)
        y_out_ref, pred_ref, ht_ref, ct_ref = refs[5 + 3 * L:9 + 3 * L]
        gproj_ref, y_scr_ref = refs[9 + 3 * L:]            # (T*Bp,4H), (T*Bp,H)

        def run_layer(l, in_ref, y_tgt):
            wih_ref = w_refs[3 * l + 0]    # (Din_l, 4H)  gate order i,f,o,g
            whh_ref = w_refs[3 * l + 1]    # (H, 4H)      gate order i,f,o,g
            b_ref = w_refs[3 * l + 2]      # (1, 4H)      b_ih + b_hh

            # 1) Whole-sequence input projection: one MXU matmul, kept
            #    lane-dense in (T*Bp, 4H) — no per-gate rearrangement.
            gproj_ref[...] = (jnp.dot(in_ref[...], wih_ref[...],
                                      preferred_element_type=jnp.float32)
                              + b_ref[...])

            # 2) Recurrence: h/c live in the loop carry (vregs).  One fused
            #    (Bp,H)x(H,4H) dot per step; gates split with static lane
            #    slices; sigmoid over the contiguous first 3H, tanh on last H.
            def step(t, carry):
                h, c = carry
                row = pl.multiple_of(t * Bp, Bp)
                x_row = gproj_ref[pl.ds(row, Bp), :]                   # (Bp, 4H)
                gates = x_row + jnp.dot(h, whh_ref[...],
                                        preferred_element_type=jnp.float32)
                sig = jax.nn.sigmoid(gates[:, :3 * H])
                g_t = jnp.tanh(gates[:, 3 * H:])
                i_t = sig[:, 0 * H:1 * H]
                f_t = sig[:, 1 * H:2 * H]
                o_t = sig[:, 2 * H:3 * H]
                c_new = f_t * c + i_t * g_t
                h_new = o_t * jnp.tanh(c_new)
                y_tgt[pl.ds(row, Bp), :] = h_new                       # full (8,128) tile
                return (h_new, c_new)

            h_fin, c_fin = lax.fori_loop(
                0, T, step, (h0_ref[l], c0_ref[l]), unroll=unroll)
            ht_ref[l] = h_fin
            ct_ref[l] = c_fin
            return h_fin

        # ---- layer stack (static Python loop, fully fused) ----------------
        in_ref = x_ref
        h_last = None
        for l in range(L):
            # Last layer writes straight into the output buffer; earlier
            # layers share one inter-layer VMEM scratch (fully consumed by the
            # next layer's input-projection matmul before being overwritten).
            y_tgt = y_out_ref if l == L - 1 else y_scr_ref
            h_last = run_layer(l, in_ref, y_tgt)
            in_ref = y_tgt

        # ---- fused linear head: pred = Linear(output[:, -1, :]) -----------
        # N=1 head -> VPU multiply + lane reduction instead of an MXU dot.
        pred_ref[...] = (jnp.sum(h_last * wlin_ref[...], axis=-1, keepdims=True)
                         + blin_ref[...])

    return kernel


# ---------------------------------------------------------------------------
# Wrapper
# ---------------------------------------------------------------------------
@functools.partial(jax.jit, static_argnames=("num_layers",))
def encoder_forward(input_seq, h0, c0, params, *, num_layers):
    """input_seq: (B, T, input_size)  batch-first, like the PyTorch module."""
    B, T, Din = input_seq.shape
    H = h0.shape[-1]
    L = num_layers

    # Pad batch to the sublane width so per-step tiles are (8,128)-aligned.
    Bp = max(8, ((B + 7) // 8) * 8)
    pad_b = Bp - B
    x_p = jnp.pad(input_seq, ((0, pad_b), (0, 0), (0, 0)))
    h0_p = jnp.pad(h0, ((0, 0), (0, pad_b), (0, 0)))
    c0_p = jnp.pad(c0, ((0, 0), (0, pad_b), (0, 0)))

    # Time-major, flattened to 2D rows (t*Bp + b): every per-timestep slab is
    # a contiguous, sublane-aligned block of Bp rows.
    x2d = jnp.transpose(x_p, (1, 0, 2)).reshape(T * Bp, Din)

    flat_w = []
    for l in range(L):
        flat_w.extend(params["lstm"][l])          # (wih_t, whh_t, b) per layer

    kernel = _make_encoder_kernel(L, T, Bp, H)
    n_in = 5 + 3 * L

    y2d, pred, h_t, c_t = pl.pallas_call(
        kernel,
        out_shape=(
            jax.ShapeDtypeStruct((T * Bp, H), jnp.float32),  # hidden states, all t
            jax.ShapeDtypeStruct((Bp, 1), jnp.float32),      # pred
            jax.ShapeDtypeStruct((L, Bp, H), jnp.float32),   # h_T per layer
            jax.ShapeDtypeStruct((L, Bp, H), jnp.float32),   # c_T per layer
        ),
        in_specs=[_VMEM] * n_in,
        out_specs=(_VMEM, _VMEM, _VMEM, _VMEM),
        scratch_shapes=[
            pltpu.VMEM((T * Bp, 4 * H), jnp.float32),  # lane-dense input projection
            pltpu.VMEM((T * Bp, H), jnp.float32),      # inter-layer activations
        ],
        compiler_params=pltpu.CompilerParams(vmem_limit_bytes=32 * 1024 * 1024),
    )(x2d, h0_p, c0_p, *flat_w, params["lin_w"], params["lin_b"])

    # Un-pad.
    output = jnp.transpose(y2d.reshape(T, Bp, H), (1, 0, 2))[:B]   # (B, T, H)
    return output, pred[:B], h_t[:, :B], c_t[:, :B]


# ---------------------------------------------------------------------------
# Parameters (match nn.LSTM / nn.Linear shapes & init bounds), pre-arranged
# for the kernel: gate blocks reordered (i,f,g,o) -> (i,f,o,g), transposed:
#   wih_t (Din, 4H), whh_t (H, 4H), b (1, 4H) = b_ih + b_hh.
# ---------------------------------------------------------------------------
def make_params(key, input_size, hidden_size, num_layers):
    H = hidden_size
    bound = 1.0 / jnp.sqrt(H)
    perm = (0, 1, 3, 2)                       # i,f,g,o -> i,f,o,g gate blocks

    def reorder_rows(w):                      # w: (4H, K) in i,f,g,o order
        return jnp.concatenate([w[g * H:(g + 1) * H] for g in perm], axis=0)

    lstm_params = []
    for layer in range(num_layers):
        din = input_size if layer == 0 else H
        key, k1, k2, k3, k4 = jax.random.split(key, 5)
        w_ih = jax.random.uniform(k1, (4 * H, din), minval=-bound, maxval=bound,
                                  dtype=jnp.float32)
        w_hh = jax.random.uniform(k2, (4 * H, H), minval=-bound, maxval=bound,
                                  dtype=jnp.float32)
        b_ih = jax.random.uniform(k3, (4 * H,), minval=-bound, maxval=bound,
                                  dtype=jnp.float32)
        b_hh = jax.random.uniform(k4, (4 * H,), minval=-bound, maxval=bound,
                                  dtype=jnp.float32)
        wih_t = reorder_rows(w_ih).T                        # (din, 4H)
        whh_t = reorder_rows(w_hh).T                        # (H, 4H)
        b = reorder_rows((b_ih + b_hh)[:, None])[:, 0][None, :]   # (1, 4H)
        lstm_params.append((wih_t, whh_t, b))

    key, k5, k6 = jax.random.split(key, 3)
    lin_w = jax.random.uniform(k5, (1, H), minval=-bound, maxval=bound,
                               dtype=jnp.float32)
    lin_b = jax.random.uniform(k6, (1,), minval=-bound, maxval=bound,
                               dtype=jnp.float32)
    return {"lstm": tuple(lstm_params),
            "lin_w": lin_w,                  # (1, H)
            "lin_b": lin_b[None, :]}         # (1, 1)


# ---------------------------------------------------------------------------
# Pure-JAX reference (for correctness check only) — same param layout.
# ---------------------------------------------------------------------------
def _reference_forward(input_seq, h0, c0, params, num_layers):
    H = h0.shape[-1]
    x = input_seq
    h_fin, c_fin = [], []
    for l in range(num_layers):
        wih_t, whh_t, b = params["lstm"][l]

        def step(carry, x_t, wih_t=wih_t, whh_t=whh_t, b=b):
            h, c = carry
            gates = x_t @ wih_t + h @ whh_t + b[0]          # gate order i,f,o,g
            i = jax.nn.sigmoid(gates[:, 0 * H:1 * H])
            f = jax.nn.sigmoid(gates[:, 1 * H:2 * H])
            o = jax.nn.sigmoid(gates[:, 2 * H:3 * H])
            g = jnp.tanh(gates[:, 3 * H:4 * H])
            c_new = f * c + i * g
            h_new = o * jnp.tanh(c_new)
            return (h_new, c_new), h_new

        (hT, cT), ys = lax.scan(step, (h0[l], c0[l]),
                                jnp.transpose(x, (1, 0, 2)))
        x = jnp.transpose(ys, (1, 0, 2))
        h_fin.append(hT)
        c_fin.append(cT)
    pred = jnp.sum(x[:, -1, :] * params["lin_w"], axis=-1, keepdims=True) \
        + params["lin_b"]
    return x, pred, jnp.stack(h_fin), jnp.stack(c_fin)


# ---------------------------------------------------------------------------
if __name__ == "__main__":
    batch_size = 2
    seq_len = 8
    embedding = 4
    input_size = embedding + 1     # module: input_size = embedding + 1
    hidden_size = 32
    num_layers = 2

    key = jax.random.PRNGKey(0)
    key, k_x, k_h, k_c, k_p = jax.random.split(key, 5)

    input_seq = jax.random.normal(
        k_x, (batch_size, seq_len, input_size), dtype=jnp.float32)
    # torch.randn initial states -> deterministic normals here.
    h0 = jax.random.normal(
        k_h, (num_layers, batch_size, hidden_size), dtype=jnp.float32)
    c0 = jax.random.normal(
        k_c, (num_layers, batch_size, hidden_size), dtype=jnp.float32)

    params = make_params(k_p, input_size, hidden_size, num_layers)

    out = encoder_forward(input_seq, h0, c0, params, num_layers=num_layers)
    jax.block_until_ready(out)
    output, pred, h_t, c_t = out

    assert output.shape == (batch_size, seq_len, hidden_size)
    assert pred.shape == (batch_size, 1)
    assert h_t.shape == (num_layers, batch_size, hidden_size)
    assert c_t.shape == (num_layers, batch_size, hidden_size)

    ref = _reference_forward(input_seq, h0, c0, params, num_layers)
    for got, want in zip(out, ref):
        assert jnp.allclose(got, want, atol=1e-4, rtol=1e-4), "mismatch vs reference"

    print("KERNEL_OK")
</pallas_src>

<mosaic_0001>
module attributes {stable_mosaic.version = 11 : i64} {
  func.func @kernel(%arg0: memref<64x5xf32, #tpu.memory_space<vmem>>, %arg1: memref<2x8x32xf32, #tpu.memory_space<vmem>>, %arg2: memref<2x8x32xf32, #tpu.memory_space<vmem>>, %arg3: memref<5x128xf32, #tpu.memory_space<vmem>>, %arg4: memref<32x128xf32, #tpu.memory_space<vmem>>, %arg5: memref<1x128xf32, #tpu.memory_space<vmem>>, %arg6: memref<32x128xf32, #tpu.memory_space<vmem>>, %arg7: memref<32x128xf32, #tpu.memory_space<vmem>>, %arg8: memref<1x128xf32, #tpu.memory_space<vmem>>, %arg9: memref<1x32xf32, #tpu.memory_space<vmem>>, %arg10: memref<1x1xf32, #tpu.memory_space<vmem>>, %arg11: memref<64x32xf32, #tpu.memory_space<vmem>>, %arg12: memref<8x1xf32, #tpu.memory_space<vmem>>, %arg13: memref<2x8x32xf32, #tpu.memory_space<vmem>>, %arg14: memref<2x8x32xf32, #tpu.memory_space<vmem>>, %arg15: memref<64x128xf32, #tpu.memory_space<vmem>>, %arg16: memref<64x32xf32, #tpu.memory_space<vmem>>) attributes {dimension_semantics = [], scalar_prefetch = 0 : i64, scratch_operands = 2 : i64, tpu.core_type = #tpu.core_type<tc>} {
    %c0 = arith.constant 0 : index
    %c0_0 = arith.constant 0 : index
    %0 = vector.load %arg0[%c0, %c0_0] : memref<64x5xf32, #tpu.memory_space<vmem>>, vector<64x5xf32>
    %c0_1 = arith.constant 0 : index
    %c0_2 = arith.constant 0 : index
    %1 = vector.load %arg3[%c0_1, %c0_2] : memref<5x128xf32, #tpu.memory_space<vmem>>, vector<5x128xf32>
    %cst = arith.constant dense<0.000000e+00> : vector<64x128xf32>
    %2 = tpu.matmul %0, %1, %cst {dimension_numbers = #tpu.dot_dimension_numbers<[1], [0], [0], [1], [0, 0, 1, 1], [], []>} : vector<64x5xf32>, vector<5x128xf32>, vector<64x128xf32> -> vector<64x128xf32>
    %c0_3 = arith.constant 0 : index
    %c0_4 = arith.constant 0 : index
    %3 = vector.load %arg5[%c0_3, %c0_4] : memref<1x128xf32, #tpu.memory_space<vmem>>, vector<1x128xf32>
    %4 = vector.broadcast %3 : vector<1x128xf32> to vector<64x128xf32>
    %5 = arith.addf %2, %4 : vector<64x128xf32>
    %c0_5 = arith.constant 0 : index
    %c0_6 = arith.constant 0 : index
    %6 = vector.load %arg15[%c0_5, %c0_6] : memref<64x128xf32, #tpu.memory_space<vmem>>, vector<64x128xf32>
    tpu.vector_store %arg15[%c0_5, %c0_6], %5 {strides = array<i32>} : memref<64x128xf32, #tpu.memory_space<vmem>>, vector<64x128xf32>,
    %c0_7 = arith.constant 0 : index
    %c0_8 = arith.constant 0 : index
    %c0_9 = arith.constant 0 : index
    %7 = vector.load %arg1[%c0_7, %c0_8, %c0_9] : memref<2x8x32xf32, #tpu.memory_space<vmem>>, vector<1x8x32xf32>
    %8 = vector.shape_cast %7 : vector<1x8x32xf32> to vector<8x32xf32>
    %c0_10 = arith.constant 0 : index
    %c0_11 = arith.constant 0 : index
    %c0_12 = arith.constant 0 : index
    %9 = vector.load %arg2[%c0_10, %c0_11, %c0_12] : memref<2x8x32xf32, #tpu.memory_space<vmem>>, vector<1x8x32xf32>
    %10 = vector.shape_cast %9 : vector<1x8x32xf32> to vector<8x32xf32>
    %c0_i32 = arith.constant 0 : i32
    %c8_i32 = arith.constant 8 : i32
    %11 = arith.muli %c0_i32, %c8_i32 : i32
    %12 = tpu.assume_multiple %11, 8 : i32
    %13 = arith.index_cast %12 : i32 to index
    %c0_13 = arith.constant 0 : index
    %14 = vector.load %arg15[%13, %c0_13] : memref<64x128xf32, #tpu.memory_space<vmem>>, vector<8x128xf32>
    %c0_14 = arith.constant 0 : index
    %c0_15 = arith.constant 0 : index
    %15 = vector.load %arg4[%c0_14, %c0_15] : memref<32x128xf32, #tpu.memory_space<vmem>>, vector<32x128xf32>
    %cst_16 = arith.constant dense<0.000000e+00> : vector<8x128xf32>
    %16 = tpu.matmul %8, %15, %cst_16 {dimension_numbers = #tpu.dot_dimension_numbers<[1], [0], [0], [1], [0, 0, 1, 1], [], []>} : vector<8x32xf32>, vector<32x128xf32>, vector<8x128xf32> -> vector<8x128xf32>
    %17 = arith.addf %14, %16 : vector<8x128xf32>
    %18 = vector.extract_strided_slice %17 {offsets = [0, 0], sizes = [8, 96], strides = [1, 1]} : vector<8x128xf32> to vector<8x96xf32>
    %19 = arith.negf %18 : vector<8x96xf32>
    %20 = math.exp %19 : vector<8x96xf32>
    %cst_17 = arith.constant 1.000000e+00 : f32
    %21 = vector.broadcast %cst_17 : f32 to vector<8x96xf32>
    %22 = arith.addf %21, %20 : vector<8x96xf32>
    %23 = arith.divf %21, %22 : vector<8x96xf32>
    %24 = vector.extract_strided_slice %17 {offsets = [0, 96], sizes = [8, 32], strides = [1, 1]} : vector<8x128xf32> to vector<8x32xf32>
    %25 = math.tanh %24 : vector<8x32xf32>
    %26 = vector.extract_strided_slice %23 {offsets = [0, 0], sizes = [8, 32], strides = [1, 1]} : vector<8x96xf32> to vector<8x32xf32>
    %27 = vector.extract_strided_slice %23 {offsets = [0, 32], sizes = [8, 32], strides = [1, 1]} : vector<8x96xf32> to vector<8x32xf32>
    %28 = vector.extract_strided_slice %23 {offsets = [0, 64], sizes = [8, 32], strides = [1, 1]} : vector<8x96xf32> to vector<8x32xf32>
    %29 = arith.mulf %27, %10 : vector<8x32xf32>
    %30 = arith.mulf %26, %25 : vector<8x32xf32>
    %31 = arith.addf %29, %30 : vector<8x32xf32>
    %32 = math.tanh %31 : vector<8x32xf32>
    %33 = arith.mulf %28, %32 : vector<8x32xf32>
    %34 = arith.index_cast %12 : i32 to index
    %c0_18 = arith.constant 0 : index
    %35 = vector.load %arg16[%34, %c0_18] : memref<64x32xf32, #tpu.memory_space<vmem>>, vector<8x32xf32>
    tpu.vector_store %arg16[%34, %c0_18], %33 {strides = array<i32>} : memref<64x32xf32, #tpu.memory_space<vmem>>, vector<8x32xf32>,
    %c1_i32 = arith.constant 1 : i32
    %c8_i32_19 = arith.constant 8 : i32
    %36 = arith.muli %c1_i32, %c8_i32_19 : i32
    %37 = tpu.assume_multiple %36, 8 : i32
    %38 = arith.index_cast %37 : i32 to index
    %c0_20 = arith.constant 0 : index
    %39 = vector.load %arg15[%38, %c0_20] : memref<64x128xf32, #tpu.memory_space<vmem>>, vector<8x128xf32>
    %c0_21 = arith.constant 0 : index
    %c0_22 = arith.constant 0 : index
    %40 = vector.load %arg4[%c0_21, %c0_22] : memref<32x128xf32, #tpu.memory_space<vmem>>, vector<32x128xf32>
    %cst_23 = arith.constant dense<0.000000e+00> : vector<8x128xf32>
    %41 = tpu.matmul %33, %40, %cst_23 {dimension_numbers = #tpu.dot_dimension_numbers<[1], [0], [0], [1], [0, 0, 1, 1], [], []>} : vector<8x32xf32>, vector<32x128xf32>, vector<8x128xf32> -> vector<8x128xf32>
    %42 = arith.addf %39, %41 : vector<8x128xf32>
    %43 = vector.extract_strided_slice %42 {offsets = [0, 0], sizes = [8, 96], strides = [1, 1]} : vector<8x128xf32> to vector<8x96xf32>
    %44 = arith.negf %43 : vector<8x96xf32>
    %45 = math.exp %44 : vector<8x96xf32>
    %cst_24 = arith.constant 1.000000e+00 : f32
    %46 = vector.broadcast %cst_24 : f32 to vector<8x96xf32>
    %47 = arith.addf %46, %45 : vector<8x96xf32>
    %48 = arith.divf %46, %47 : vector<8x96xf32>
    %49 = vector.extract_strided_slice %42 {offsets = [0, 96], sizes = [8, 32], strides = [1, 1]} : vector<8x128xf32> to vector<8x32xf32>
    %50 = math.tanh %49 : vector<8x32xf32>
    %51 = vector.extract_strided_slice %48 {offsets = [0, 0], sizes = [8, 32], strides = [1, 1]} : vector<8x96xf32> to vector<8x32xf32>
    %52 = vector.extract_strided_slice %48 {offsets = [0, 32], sizes = [8, 32], strides = [1, 1]} : vector<8x96xf32> to vector<8x32xf32>
    %53 = vector.extract_strided_slice %48 {offsets = [0, 64], sizes = [8, 32], strides = [1, 1]} : vector<8x96xf32> to vector<8x32xf32>
    %54 = arith.mulf %52, %31 : vector<8x32xf32>
    %55 = arith.mulf %51, %50 : vector<8x32xf32>
    %56 = arith.addf %54, %55 : vector<8x32xf32>
    %57 = math.tanh %56 : vector<8x32xf32>
    %58 = arith.mulf %53, %57 : vector<8x32xf32>
    %59 = arith.index_cast %37 : i32 to index
    %c0_25 = arith.constant 0 : index
    %60 = vector.load %arg16[%59, %c0_25] : memref<64x32xf32, #tpu.memory_space<vmem>>, vector<8x32xf32>
    tpu.vector_store %arg16[%59, %c0_25], %58 {strides = array<i32>} : memref<64x32xf32, #tpu.memory_space<vmem>>, vector<8x32xf32>,
    %c2_i32 = arith.constant 2 : i32
    %c8_i32_26 = arith.constant 8 : i32
    %61 = arith.muli %c2_i32, %c8_i32_26 : i32
    %62 = tpu.assume_multiple %61, 8 : i32
    %63 = arith.index_cast %62 : i32 to index
    %c0_27 = arith.constant 0 : index
    %64 = vector.load %arg15[%63, %c0_27] : memref<64x128xf32, #tpu.memory_space<vmem>>, vector<8x128xf32>
    %c0_28 = arith.constant 0 : index
    %c0_29 = arith.constant 0 : index
    %65 = vector.load %arg4[%c0_28, %c0_29] : memref<32x128xf32, #tpu.memory_space<vmem>>, vector<32x128xf32>
    %cst_30 = arith.constant dense<0.000000e+00> : vector<8x128xf32>
    %66 = tpu.matmul %58, %65, %cst_30 {dimension_numbers = #tpu.dot_dimension_numbers<[1], [0], [0], [1], [0, 0, 1, 1], [], []>} : vector<8x32xf32>, vector<32x128xf32>, vector<8x128xf32> -> vector<8x128xf32>
    %67 = arith.addf %64, %66 : vector<8x128xf32>
    %68 = vector.extract_strided_slice %67 {offsets = [0, 0], sizes = [8, 96], strides = [1, 1]} : vector<8x128xf32> to vector<8x96xf32>
    %69 = arith.negf %68 : vector<8x96xf32>
    %70 = math.exp %69 : vector<8x96xf32>
    %cst_31 = arith.constant 1.000000e+00 : f32
    %71 = vector.broadcast %cst_31 : f32 to vector<8x96xf32>
    %72 = arith.addf %71, %70 : vector<8x96xf32>
    %73 = arith.divf %71, %72 : vector<8x96xf32>
    %74 = vector.extract_strided_slice %67 {offsets = [0, 96], sizes = [8, 32], strides = [1, 1]} : vector<8x128xf32> to vector<8x32xf32>
    %75 = math.tanh %74 : vector<8x32xf32>
    %76 = vector.extract_strided_slice %73 {offsets = [0, 0], sizes = [8, 32], strides = [1, 1]} : vector<8x96xf32> to vector<8x32xf32>
    %77 = vector.extract_strided_slice %73 {offsets = [0, 32], sizes = [8, 32], strides = [1, 1]} : vector<8x96xf32> to vector<8x32xf32>
    %78 = vector.extract_strided_slice %73 {offsets = [0, 64], sizes = [8, 32], strides = [1, 1]} : vector<8x96xf32> to vector<8x32xf32>
    %79 = arith.mulf %77, %56 : vector<8x32xf32>
    %80 = arith.mulf %76, %75 : vector<8x32xf32>
    %81 = arith.addf %79, %80 : vector<8x32xf32>
    %82 = math.tanh %81 : vector<8x32xf32>
    %83 = arith.mulf %78, %82 : vector<8x32xf32>
    %84 = arith.index_cast %62 : i32 to index
    %c0_32 = arith.constant 0 : index
    %85 = vector.load %arg16[%84, %c0_32] : memref<64x32xf32, #tpu.memory_space<vmem>>, vector<8x32xf32>
    tpu.vector_store %arg16[%84, %c0_32], %83 {strides = array<i32>} : memref<64x32xf32, #tpu.memory_space<vmem>>, vector<8x32xf32>,
    %c3_i32 = arith.constant 3 : i32
    %c8_i32_33 = arith.constant 8 : i32
    %86 = arith.muli %c3_i32, %c8_i32_33 : i32
    %87 = tpu.assume_multiple %86, 8 : i32
    %88 = arith.index_cast %87 : i32 to index
    %c0_34 = arith.constant 0 : index
    %89 = vector.load %arg15[%88, %c0_34] : memref<64x128xf32, #tpu.memory_space<vmem>>, vector<8x128xf32>
    %c0_35 = arith.constant 0 : index
    %c0_36 = arith.constant 0 : index
    %90 = vector.load %arg4[%c0_35, %c0_36] : memref<32x128xf32, #tpu.memory_space<vmem>>, vector<32x128xf32>
    %cst_37 = arith.constant dense<0.000000e+00> : vector<8x128xf32>
    %91 = tpu.matmul %83, %90, %cst_37 {dimension_numbers = #tpu.dot_dimension_numbers<[1], [0], [0], [1], [0, 0, 1, 1], [], []>} : vector<8x32xf32>, vector<32x128xf32>, vector<8x128xf32> -> vector<8x128xf32>
    %92 = arith.addf %89, %91 : vector<8x128xf32>
    %93 = vector.extract_strided_slice %92 {offsets = [0, 0], sizes = [8, 96], strides = [1, 1]} : vector<8x128xf32> to vector<8x96xf32>
    %94 = arith.negf %93 : vector<8x96xf32>
    %95 = math.exp %94 : vector<8x96xf32>
    %cst_38 = arith.constant 1.000000e+00 : f32
    %96 = vector.broadcast %cst_38 : f32 to vector<8x96xf32>
    %97 = arith.addf %96, %95 : vector<8x96xf32>
    %98 = arith.divf %96, %97 : vector<8x96xf32>
    %99 = vector.extract_strided_slice %92 {offsets = [0, 96], sizes = [8, 32], strides = [1, 1]} : vector<8x128xf32> to vector<8x32xf32>
    %100 = math.tanh %99 : vector<8x32xf32>
    %101 = vector.extract_strided_slice %98 {offsets = [0, 0], sizes = [8, 32], strides = [1, 1]} : vector<8x96xf32> to vector<8x32xf32>
    %102 = vector.extract_strided_slice %98 {offsets = [0, 32], sizes = [8, 32], strides = [1, 1]} : vector<8x96xf32> to vector<8x32xf32>
    %103 = vector.extract_strided_slice %98 {offsets = [0, 64], sizes = [8, 32], strides = [1, 1]} : vector<8x96xf32> to vector<8x32xf32>
    %104 = arith.mulf %102, %81 : vector<8x32xf32>
    %105 = arith.mulf %101, %100 : vector<8x32xf32>
    %106 = arith.addf %104, %105 : vector<8x32xf32>
    %107 = math.tanh %106 : vector<8x32xf32>
    %108 = arith.mulf %103, %107 : vector<8x32xf32>
    %109 = arith.index_cast %87 : i32 to index
    %c0_39 = arith.constant 0 : index
    %110 = vector.load %arg16[%109, %c0_39] : memref<64x32xf32, #tpu.memory_space<vmem>>, vector<8x32xf32>
    tpu.vector_store %arg16[%109, %c0_39], %108 {strides = array<i32>} : memref<64x32xf32, #tpu.memory_space<vmem>>, vector<8x32xf32>,
    %c4_i32 = arith.constant 4 : i32
    %c8_i32_40 = arith.constant 8 : i32
    %111 = arith.muli %c4_i32, %c8_i32_40 : i32
    %112 = tpu.assume_multiple %111, 8 : i32
    %113 = arith.index_cast %112 : i32 to index
    %c0_41 = arith.constant 0 : index
    %114 = vector.load %arg15[%113, %c0_41] : memref<64x128xf32, #tpu.memory_space<vmem>>, vector<8x128xf32>
    %c0_42 = arith.constant 0 : index
    %c0_43 = arith.constant 0 : index
    %115 = vector.load %arg4[%c0_42, %c0_43] : memref<32x128xf32, #tpu.memory_space<vmem>>, vector<32x128xf32>
    %cst_44 = arith.constant dense<0.000000e+00> : vector<8x128xf32>
    %116 = tpu.matmul %108, %115, %cst_44 {dimension_numbers = #tpu.dot_dimension_numbers<[1], [0], [0], [1], [0, 0, 1, 1], [], []>} : vector<8x32xf32>, vector<32x128xf32>, vector<8x128xf32> -> vector<8x128xf32>
    %117 = arith.addf %114, %116 : vector<8x128xf32>
    %118 = vector.extract_strided_slice %117 {offsets = [0, 0], sizes = [8, 96], strides = [1, 1]} : vector<8x128xf32> to vector<8x96xf32>
    %119 = arith.negf %118 : vector<8x96xf32>
    %120 = math.exp %119 : vector<8x96xf32>
    %cst_45 = arith.constant 1.000000e+00 : f32
    %121 = vector.broadcast %cst_45 : f32 to vector<8x96xf32>
    %122 = arith.addf %121, %120 : vector<8x96xf32>
    %123 = arith.divf %121, %122 : vector<8x96xf32>
    %124 = vector.extract_strided_slice %117 {offsets = [0, 96], sizes = [8, 32], strides = [1, 1]} : vector<8x128xf32> to vector<8x32xf32>
    %125 = math.tanh %124 : vector<8x32xf32>
    %126 = vector.extract_strided_slice %123 {offsets = [0, 0], sizes = [8, 32], strides = [1, 1]} : vector<8x96xf32> to vector<8x32xf32>
    %127 = vector.extract_strided_slice %123 {offsets = [0, 32], sizes = [8, 32], strides = [1, 1]} : vector<8x96xf32> to vector<8x32xf32>
    %128 = vector.extract_strided_slice %123 {offsets = [0, 64], sizes = [8, 32], strides = [1, 1]} : vector<8x96xf32> to vector<8x32xf32>
    %129 = arith.mulf %127, %106 : vector<8x32xf32>
    %130 = arith.mulf %126, %125 : vector<8x32xf32>
    %131 = arith.addf %129, %130 : vector<8x32xf32>
    %132 = math.tanh %131 : vector<8x32xf32>
    %133 = arith.mulf %128, %132 : vector<8x32xf32>
    %134 = arith.index_cast %112 : i32 to index
    %c0_46 = arith.constant 0 : index
    %135 = vector.load %arg16[%134, %c0_46] : memref<64x32xf32, #tpu.memory_space<vmem>>, vector<8x32xf32>
    tpu.vector_store %arg16[%134, %c0_46], %133 {strides = array<i32>} : memref<64x32xf32, #tpu.memory_space<vmem>>, vector<8x32xf32>,
    %c5_i32 = arith.constant 5 : i32
    %c8_i32_47 = arith.constant 8 : i32
    %136 = arith.muli %c5_i32, %c8_i32_47 : i32
    %137 = tpu.assume_multiple %136, 8 : i32
    %138 = arith.index_cast %137 : i32 to index
    %c0_48 = arith.constant 0 : index
    %139 = vector.load %arg15[%138, %c0_48] : memref<64x128xf32, #tpu.memory_space<vmem>>, vector<8x128xf32>
    %c0_49 = arith.constant 0 : index
    %c0_50 = arith.constant 0 : index
    %140 = vector.load %arg4[%c0_49, %c0_50] : memref<32x128xf32, #tpu.memory_space<vmem>>, vector<32x128xf32>
    %cst_51 = arith.constant dense<0.000000e+00> : vector<8x128xf32>
    %141 = tpu.matmul %133, %140, %cst_51 {dimension_numbers = #tpu.dot_dimension_numbers<[1], [0], [0], [1], [0, 0, 1, 1], [], []>} : vector<8x32xf32>, vector<32x128xf32>, vector<8x128xf32> -> vector<8x128xf32>
    %142 = arith.addf %139, %141 : vector<8x128xf32>
    %143 = vector.extract_strided_slice %142 {offsets = [0, 0], sizes = [8, 96], strides = [1, 1]} : vector<8x128xf32> to vector<8x96xf32>
    %144 = arith.negf %143 : vector<8x96xf32>
    %145 = math.exp %144 : vector<8x96xf32>
    %cst_52 = arith.constant 1.000000e+00 : f32
    %146 = vector.broadcast %cst_52 : f32 to vector<8x96xf32>
    %147 = arith.addf %146, %145 : vector<8x96xf32>
    %148 = arith.divf %146, %147 : vector<8x96xf32>
    %149 = vector.extract_strided_slice %142 {offsets = [0, 96], sizes = [8, 32], strides = [1, 1]} : vector<8x128xf32> to vector<8x32xf32>
    %150 = math.tanh %149 : vector<8x32xf32>
    %151 = vector.extract_strided_slice %148 {offsets = [0, 0], sizes = [8, 32], strides = [1, 1]} : vector<8x96xf32> to vector<8x32xf32>
    %152 = vector.extract_strided_slice %148 {offsets = [0, 32], sizes = [8, 32], strides = [1, 1]} : vector<8x96xf32> to vector<8x32xf32>
    %153 = vector.extract_strided_slice %148 {offsets = [0, 64], sizes = [8, 32], strides = [1, 1]} : vector<8x96xf32> to vector<8x32xf32>
    %154 = arith.mulf %152, %131 : vector<8x32xf32>
    %155 = arith.mulf %151, %150 : vector<8x32xf32>
    %156 = arith.addf %154, %155 : vector<8x32xf32>
    %157 = math.tanh %156 : vector<8x32xf32>
    %158 = arith.mulf %153, %157 : vector<8x32xf32>
    %159 = arith.index_cast %137 : i32 to index
    %c0_53 = arith.constant 0 : index
    %160 = vector.load %arg16[%159, %c0_53] : memref<64x32xf32, #tpu.memory_space<vmem>>, vector<8x32xf32>
    tpu.vector_store %arg16[%159, %c0_53], %158 {strides = array<i32>} : memref<64x32xf32, #tpu.memory_space<vmem>>, vector<8x32xf32>,
    %c6_i32 = arith.constant 6 : i32
    %c8_i32_54 = arith.constant 8 : i32
    %161 = arith.muli %c6_i32, %c8_i32_54 : i32
    %162 = tpu.assume_multiple %161, 8 : i32
    %163 = arith.index_cast %162 : i32 to index
    %c0_55 = arith.constant 0 : index
    %164 = vector.load %arg15[%163, %c0_55] : memref<64x128xf32, #tpu.memory_space<vmem>>, vector<8x128xf32>
    %c0_56 = arith.constant 0 : index
    %c0_57 = arith.constant 0 : index
    %165 = vector.load %arg4[%c0_56, %c0_57] : memref<32x128xf32, #tpu.memory_space<vmem>>, vector<32x128xf32>
    %cst_58 = arith.constant dense<0.000000e+00> : vector<8x128xf32>
    %166 = tpu.matmul %158, %165, %cst_58 {dimension_numbers = #tpu.dot_dimension_numbers<[1], [0], [0], [1], [0, 0, 1, 1], [], []>} : vector<8x32xf32>, vector<32x128xf32>, vector<8x128xf32> -> vector<8x128xf32>
    %167 = arith.addf %164, %166 : vector<8x128xf32>
    %168 = vector.extract_strided_slice %167 {offsets = [0, 0], sizes = [8, 96], strides = [1, 1]} : vector<8x128xf32> to vector<8x96xf32>
    %169 = arith.negf %168 : vector<8x96xf32>
    %170 = math.exp %169 : vector<8x96xf32>
    %cst_59 = arith.constant 1.000000e+00 : f32
    %171 = vector.broadcast %cst_59 : f32 to vector<8x96xf32>
    %172 = arith.addf %171, %170 : vector<8x96xf32>
    %173 = arith.divf %171, %172 : vector<8x96xf32>
    %174 = vector.extract_strided_slice %167 {offsets = [0, 96], sizes = [8, 32], strides = [1, 1]} : vector<8x128xf32> to vector<8x32xf32>
    %175 = math.tanh %174 : vector<8x32xf32>
    %176 = vector.extract_strided_slice %173 {offsets = [0, 0], sizes = [8, 32], strides = [1, 1]} : vector<8x96xf32> to vector<8x32xf32>
    %177 = vector.extract_strided_slice %173 {offsets = [0, 32], sizes = [8, 32], strides = [1, 1]} : vector<8x96xf32> to vector<8x32xf32>
    %178 = vector.extract_strided_slice %173 {offsets = [0, 64], sizes = [8, 32], strides = [1, 1]} : vector<8x96xf32> to vector<8x32xf32>
    %179 = arith.mulf %177, %156 : vector<8x32xf32>
    %180 = arith.mulf %176, %175 : vector<8x32xf32>
    %181 = arith.addf %179, %180 : vector<8x32xf32>
    %182 = math.tanh %181 : vector<8x32xf32>
    %183 = arith.mulf %178, %182 : vector<8x32xf32>
    %184 = arith.index_cast %162 : i32 to index
    %c0_60 = arith.constant 0 : index
    %185 = vector.load %arg16[%184, %c0_60] : memref<64x32xf32, #tpu.memory_space<vmem>>, vector<8x32xf32>
    tpu.vector_store %arg16[%184, %c0_60], %183 {strides = array<i32>} : memref<64x32xf32, #tpu.memory_space<vmem>>, vector<8x32xf32>,
    %c7_i32 = arith.constant 7 : i32
    %c8_i32_61 = arith.constant 8 : i32
    %186 = arith.muli %c7_i32, %c8_i32_61 : i32
    %187 = tpu.assume_multiple %186, 8 : i32
    %188 = arith.index_cast %187 : i32 to index
    %c0_62 = arith.constant 0 : index
    %189 = vector.load %arg15[%188, %c0_62] : memref<64x128xf32, #tpu.memory_space<vmem>>, vector<8x128xf32>
    %c0_63 = arith.constant 0 : index
    %c0_64 = arith.constant 0 : index
    %190 = vector.load %arg4[%c0_63, %c0_64] : memref<32x128xf32, #tpu.memory_space<vmem>>, vector<32x128xf32>
    %cst_65 = arith.constant dense<0.000000e+00> : vector<8x128xf32>
    %191 = tpu.matmul %183, %190, %cst_65 {dimension_numbers = #tpu.dot_dimension_numbers<[1], [0], [0], [1], [0, 0, 1, 1], [], []>} : vector<8x32xf32>, vector<32x128xf32>, vector<8x128xf32> -> vector<8x128xf32>
    %192 = arith.addf %189, %191 : vector<8x128xf32>
    %193 = vector.extract_strided_slice %192 {offsets = [0, 0], sizes = [8, 96], strides = [1, 1]} : vector<8x128xf32> to vector<8x96xf32>
    %194 = arith.negf %193 : vector<8x96xf32>
    %195 = math.exp %194 : vector<8x96xf32>
    %cst_66 = arith.constant 1.000000e+00 : f32
    %196 = vector.broadcast %cst_66 : f32 to vector<8x96xf32>
    %197 = arith.addf %196, %195 : vector<8x96xf32>
    %198 = arith.divf %196, %197 : vector<8x96xf32>
    %199 = vector.extract_strided_slice %192 {offsets = [0, 96], sizes = [8, 32], strides = [1, 1]} : vector<8x128xf32> to vector<8x32xf32>
    %200 = math.tanh %199 : vector<8x32xf32>
    %201 = vector.extract_strided_slice %198 {offsets = [0, 0], sizes = [8, 32], strides = [1, 1]} : vector<8x96xf32> to vector<8x32xf32>
    %202 = vector.extract_strided_slice %198 {offsets = [0, 32], sizes = [8, 32], strides = [1, 1]} : vector<8x96xf32> to vector<8x32xf32>
    %203 = vector.extract_strided_slice %198 {offsets = [0, 64], sizes = [8, 32], strides = [1, 1]} : vector<8x96xf32> to vector<8x32xf32>
    %204 = arith.mulf %202, %181 : vector<8x32xf32>
    %205 = arith.mulf %201, %200 : vector<8x32xf32>
    %206 = arith.addf %204, %205 : vector<8x32xf32>
    %207 = math.tanh %206 : vector<8x32xf32>
    %208 = arith.mulf %203, %207 : vector<8x32xf32>
    %209 = arith.index_cast %187 : i32 to index
    %c0_67 = arith.constant 0 : index
    %210 = vector.load %arg16[%209, %c0_67] : memref<64x32xf32, #tpu.memory_space<vmem>>, vector<8x32xf32>
    tpu.vector_store %arg16[%209, %c0_67], %208 {strides = array<i32>} : memref<64x32xf32, #tpu.memory_space<vmem>>, vector<8x32xf32>,
    %c8_i32_68 = arith.constant 8 : i32
    %c0_69 = arith.constant 0 : index
    %c0_70 = arith.constant 0 : index
    %c0_71 = arith.constant 0 : index
    %211 = vector.load %arg13[%c0_69, %c0_70, %c0_71] : memref<2x8x32xf32, #tpu.memory_space<vmem>>, vector<1x8x32xf32>
    %212 = vector.shape_cast %211 : vector<1x8x32xf32> to vector<8x32xf32>
    %213 = vector.shape_cast %208 : vector<8x32xf32> to vector<1x8x32xf32>
    tpu.vector_store %arg13[%c0_69, %c0_70, %c0_71], %213 {strides = array<i32>} : memref<2x8x32xf32, #tpu.memory_space<vmem>>, vector<1x8x32xf32>,
    %c0_72 = arith.constant 0 : index
    %c0_73 = arith.constant 0 : index
    %c0_74 = arith.constant 0 : index
    %214 = vector.load %arg14[%c0_72, %c0_73, %c0_74] : memref<2x8x32xf32, #tpu.memory_space<vmem>>, vector<1x8x32xf32>
    %215 = vector.shape_cast %214 : vector<1x8x32xf32> to vector<8x32xf32>
    %216 = vector.shape_cast %206 : vector<8x32xf32> to vector<1x8x32xf32>
    tpu.vector_store %arg14[%c0_72, %c0_73, %c0_74], %216 {strides = array<i32>} : memref<2x8x32xf32, #tpu.memory_space<vmem>>, vector<1x8x32xf32>,
    %c0_75 = arith.constant 0 : index
    %c0_76 = arith.constant 0 : index
    %217 = vector.load %arg16[%c0_75, %c0_76] : memref<64x32xf32, #tpu.memory_space<vmem>>, vector<64x32xf32>
    %c0_77 = arith.constant 0 : index
    %c0_78 = arith.constant 0 : index
    %218 = vector.load %arg6[%c0_77, %c0_78] : memref<32x128xf32, #tpu.memory_space<vmem>>, vector<32x128xf32>
    %cst_79 = arith.constant dense<0.000000e+00> : vector<64x128xf32>
    %219 = tpu.matmul %217, %218, %cst_79 {dimension_numbers = #tpu.dot_dimension_numbers<[1], [0], [0], [1], [0, 0, 1, 1], [], []>} : vector<64x32xf32>, vector<32x128xf32>, vector<64x128xf32> -> vector<64x128xf32>
    %c0_80 = arith.constant 0 : index
    %c0_81 = arith.constant 0 : index
    %220 = vector.load %arg8[%c0_80, %c0_81] : memref<1x128xf32, #tpu.memory_space<vmem>>, vector<1x128xf32>
    %221 = vector.broadcast %220 : vector<1x128xf32> to vector<64x128xf32>
    %222 = arith.addf %219, %221 : vector<64x128xf32>
    %c0_82 = arith.constant 0 : index
    %c0_83 = arith.constant 0 : index
    %223 = vector.load %arg15[%c0_82, %c0_83] : memref<64x128xf32, #tpu.memory_space<vmem>>, vector<64x128xf32>
    tpu.vector_store %arg15[%c0_82, %c0_83], %222 {strides = array<i32>} : memref<64x128xf32, #tpu.memory_space<vmem>>, vector<64x128xf32>,
    %c1 = arith.constant 1 : index
    %c0_84 = arith.constant 0 : index
    %c0_85 = arith.constant 0 : index
    %224 = vector.load %arg1[%c1, %c0_84, %c0_85] : memref<2x8x32xf32, #tpu.memory_space<vmem>>, vector<1x8x32xf32>
    %225 = vector.shape_cast %224 : vector<1x8x32xf32> to vector<8x32xf32>
    %c1_86 = arith.constant 1 : index
    %c0_87 = arith.constant 0 : index
    %c0_88 = arith.constant 0 : index
    %226 = vector.load %arg2[%c1_86, %c0_87, %c0_88] : memref<2x8x32xf32, #tpu.memory_space<vmem>>, vector<1x8x32xf32>
    %227 = vector.shape_cast %226 : vector<1x8x32xf32> to vector<8x32xf32>
    %c0_i32_89 = arith.constant 0 : i32
    %c8_i32_90 = arith.constant 8 : i32
    %228 = arith.muli %c0_i32_89, %c8_i32_90 : i32
    %229 = tpu.assume_multiple %228, 8 : i32
    %230 = arith.index_cast %229 : i32 to index
    %c0_91 = arith.constant 0 : index
    %231 = vector.load %arg15[%230, %c0_91] : memref<64x128xf32, #tpu.memory_space<vmem>>, vector<8x128xf32>
    %c0_92 = arith.constant 0 : index
    %c0_93 = arith.constant 0 : index
    %232 = vector.load %arg7[%c0_92, %c0_93] : memref<32x128xf32, #tpu.memory_space<vmem>>, vector<32x128xf32>
    %cst_94 = arith.constant dense<0.000000e+00> : vector<8x128xf32>
    %233 = tpu.matmul %225, %232, %cst_94 {dimension_numbers = #tpu.dot_dimension_numbers<[1], [0], [0], [1], [0, 0, 1, 1], [], []>} : vector<8x32xf32>, vector<32x128xf32>, vector<8x128xf32> -> vector<8x128xf32>
    %234 = arith.addf %231, %233 : vector<8x128xf32>
    %235 = vector.extract_strided_slice %234 {offsets = [0, 0], sizes = [8, 96], strides = [1, 1]} : vector<8x128xf32> to vector<8x96xf32>
    %236 = arith.negf %235 : vector<8x96xf32>
    %237 = math.exp %236 : vector<8x96xf32>
    %cst_95 = arith.constant 1.000000e+00 : f32
    %238 = vector.broadcast %cst_95 : f32 to vector<8x96xf32>
    %239 = arith.addf %238, %237 : vector<8x96xf32>
    %240 = arith.divf %238, %239 : vector<8x96xf32>
    %241 = vector.extract_strided_slice %234 {offsets = [0, 96], sizes = [8, 32], strides = [1, 1]} : vector<8x128xf32> to vector<8x32xf32>
    %242 = math.tanh %241 : vector<8x32xf32>
    %243 = vector.extract_strided_slice %240 {offsets = [0, 0], sizes = [8, 32], strides = [1, 1]} : vector<8x96xf32> to vector<8x32xf32>
    %244 = vector.extract_strided_slice %240 {offsets = [0, 32], sizes = [8, 32], strides = [1, 1]} : vector<8x96xf32> to vector<8x32xf32>
    %245 = vector.extract_strided_slice %240 {offsets = [0, 64], sizes = [8, 32], strides = [1, 1]} : vector<8x96xf32> to vector<8x32xf32>
    %246 = arith.mulf %244, %227 : vector<8x32xf32>
    %247 = arith.mulf %243, %242 : vector<8x32xf32>
    %248 = arith.addf %246, %247 : vector<8x32xf32>
    %249 = math.tanh %248 : vector<8x32xf32>
    %250 = arith.mulf %245, %249 : vector<8x32xf32>
    %251 = arith.index_cast %229 : i32 to index
    %c0_96 = arith.constant 0 : index
    %252 = vector.load %arg11[%251, %c0_96] : memref<64x32xf32, #tpu.memory_space<vmem>>, vector<8x32xf32>
    tpu.vector_store %arg11[%251, %c0_96], %250 {strides = array<i32>} : memref<64x32xf32, #tpu.memory_space<vmem>>, vector<8x32xf32>,
    %c1_i32_97 = arith.constant 1 : i32
    %c8_i32_98 = arith.constant 8 : i32
    %253 = arith.muli %c1_i32_97, %c8_i32_98 : i32
    %254 = tpu.assume_multiple %253, 8 : i32
    %255 = arith.index_cast %254 : i32 to index
    %c0_99 = arith.constant 0 : index
    %256 = vector.load %arg15[%255, %c0_99] : memref<64x128xf32, #tpu.memory_space<vmem>>, vector<8x128xf32>
    %c0_100 = arith.constant 0 : index
    %c0_101 = arith.constant 0 : index
    %257 = vector.load %arg7[%c0_100, %c0_101] : memref<32x128xf32, #tpu.memory_space<vmem>>, vector<32x128xf32>
    %cst_102 = arith.constant dense<0.000000e+00> : vector<8x128xf32>
    %258 = tpu.matmul %250, %257, %cst_102 {dimension_numbers = #tpu.dot_dimension_numbers<[1], [0], [0], [1], [0, 0, 1, 1], [], []>} : vector<8x32xf32>, vector<32x128xf32>, vector<8x128xf32> -> vector<8x128xf32>
    %259 = arith.addf %256, %258 : vector<8x128xf32>
    %260 = vector.extract_strided_slice %259 {offsets = [0, 0], sizes = [8, 96], strides = [1, 1]} : vector<8x128xf32> to vector<8x96xf32>
    %261 = arith.negf %260 : vector<8x96xf32>
    %262 = math.exp %261 : vector<8x96xf32>
    %cst_103 = arith.constant 1.000000e+00 : f32
    %263 = vector.broadcast %cst_103 : f32 to vector<8x96xf32>
    %264 = arith.addf %263, %262 : vector<8x96xf32>
    %265 = arith.divf %263, %264 : vector<8x96xf32>
    %266 = vector.extract_strided_slice %259 {offsets = [0, 96], sizes = [8, 32], strides = [1, 1]} : vector<8x128xf32> to vector<8x32xf32>
    %267 = math.tanh %266 : vector<8x32xf32>
    %268 = vector.extract_strided_slice %265 {offsets = [0, 0], sizes = [8, 32], strides = [1, 1]} : vector<8x96xf32> to vector<8x32xf32>
    %269 = vector.extract_strided_slice %265 {offsets = [0, 32], sizes = [8, 32], strides = [1, 1]} : vector<8x96xf32> to vector<8x32xf32>
    %270 = vector.extract_strided_slice %265 {offsets = [0, 64], sizes = [8, 32], strides = [1, 1]} : vector<8x96xf32> to vector<8x32xf32>
    %271 = arith.mulf %269, %248 : vector<8x32xf32>
    %272 = arith.mulf %268, %267 : vector<8x32xf32>
    %273 = arith.addf %271, %272 : vector<8x32xf32>
    %274 = math.tanh %273 : vector<8x32xf32>
    %275 = arith.mulf %270, %274 : vector<8x32xf32>
    %276 = arith.index_cast %254 : i32 to index
    %c0_104 = arith.constant 0 : index
    %277 = vector.load %arg11[%276, %c0_104] : memref<64x32xf32, #tpu.memory_space<vmem>>, vector<8x32xf32>
    tpu.vector_store %arg11[%276, %c0_104], %275 {strides = array<i32>} : memref<64x32xf32, #tpu.memory_space<vmem>>, vector<8x32xf32>,
    %c2_i32_105 = arith.constant 2 : i32
    %c8_i32_106 = arith.constant 8 : i32
    %278 = arith.muli %c2_i32_105, %c8_i32_106 : i32
    %279 = tpu.assume_multiple %278, 8 : i32
    %280 = arith.index_cast %279 : i32 to index
    %c0_107 = arith.constant 0 : index
    %281 = vector.load %arg15[%280, %c0_107] : memref<64x128xf32, #tpu.memory_space<vmem>>, vector<8x128xf32>
    %c0_108 = arith.constant 0 : index
    %c0_109 = arith.constant 0 : index
    %282 = vector.load %arg7[%c0_108, %c0_109] : memref<32x128xf32, #tpu.memory_space<vmem>>, vector<32x128xf32>
    %cst_110 = arith.constant dense<0.000000e+00> : vector<8x128xf32>
    %283 = tpu.matmul %275, %282, %cst_110 {dimension_numbers = #tpu.dot_dimension_numbers<[1], [0], [0], [1], [0, 0, 1, 1], [], []>} : vector<8x32xf32>, vector<32x128xf32>, vector<8x128xf32> -> vector<8x128xf32>
    %284 = arith.addf %281, %283 : vector<8x128xf32>
    %285 = vector.extract_strided_slice %284 {offsets = [0, 0], sizes = [8, 96], strides = [1, 1]} : vector<8x128xf32> to vector<8x96xf32>
    %286 = arith.negf %285 : vector<8x96xf32>
    %287 = math.exp %286 : vector<8x96xf32>
    %cst_111 = arith.constant 1.000000e+00 : f32
    %288 = vector.broadcast %cst_111 : f32 to vector<8x96xf32>
    %289 = arith.addf %288, %287 : vector<8x96xf32>
    %290 = arith.divf %288, %289 : vector<8x96xf32>
    %291 = vector.extract_strided_slice %284 {offsets = [0, 96], sizes = [8, 32], strides = [1, 1]} : vector<8x128xf32> to vector<8x32xf32>
    %292 = math.tanh %291 : vector<8x32xf32>
    %293 = vector.extract_strided_slice %290 {offsets = [0, 0], sizes = [8, 32], strides = [1, 1]} : vector<8x96xf32> to vector<8x32xf32>
    %294 = vector.extract_strided_slice %290 {offsets = [0, 32], sizes = [8, 32], strides = [1, 1]} : vector<8x96xf32> to vector<8x32xf32>
    %295 = vector.extract_strided_slice %290 {offsets = [0, 64], sizes = [8, 32], strides = [1, 1]} : vector<8x96xf32> to vector<8x32xf32>
    %296 = arith.mulf %294, %273 : vector<8x32xf32>
    %297 = arith.mulf %293, %292 : vector<8x32xf32>
    %298 = arith.addf %296, %297 : vector<8x32xf32>
    %299 = math.tanh %298 : vector<8x32xf32>
    %300 = arith.mulf %295, %299 : vector<8x32xf32>
    %301 = arith.index_cast %279 : i32 to index
    %c0_112 = arith.constant 0 : index
    %302 = vector.load %arg11[%301, %c0_112] : memref<64x32xf32, #tpu.memory_space<vmem>>, vector<8x32xf32>
    tpu.vector_store %arg11[%301, %c0_112], %300 {strides = array<i32>} : memref<64x32xf32, #tpu.memory_space<vmem>>, vector<8x32xf32>,
    %c3_i32_113 = arith.constant 3 : i32
    %c8_i32_114 = arith.constant 8 : i32
    %303 = arith.muli %c3_i32_113, %c8_i32_114 : i32
    %304 = tpu.assume_multiple %303, 8 : i32
    %305 = arith.index_cast %304 : i32 to index
    %c0_115 = arith.constant 0 : index
    %306 = vector.load %arg15[%305, %c0_115] : memref<64x128xf32, #tpu.memory_space<vmem>>, vector<8x128xf32>
    %c0_116 = arith.constant 0 : index
    %c0_117 = arith.constant 0 : index
    %307 = vector.load %arg7[%c0_116, %c0_117] : memref<32x128xf32, #tpu.memory_space<vmem>>, vector<32x128xf32>
    %cst_118 = arith.constant dense<0.000000e+00> : vector<8x128xf32>
    %308 = tpu.matmul %300, %307, %cst_118 {dimension_numbers = #tpu.dot_dimension_numbers<[1], [0], [0], [1], [0, 0, 1, 1], [], []>} : vector<8x32xf32>, vector<32x128xf32>, vector<8x128xf32> -> vector<8x128xf32>
    %309 = arith.addf %306, %308 : vector<8x128xf32>
    %310 = vector.extract_strided_slice %309 {offsets = [0, 0], sizes = [8, 96], strides = [1, 1]} : vector<8x128xf32> to vector<8x96xf32>
    %311 = arith.negf %310 : vector<8x96xf32>
    %312 = math.exp %311 : vector<8x96xf32>
    %cst_119 = arith.constant 1.000000e+00 : f32
    %313 = vector.broadcast %cst_119 : f32 to vector<8x96xf32>
    %314 = arith.addf %313, %312 : vector<8x96xf32>
    %315 = arith.divf %313, %314 : vector<8x96xf32>
    %316 = vector.extract_strided_slice %309 {offsets = [0, 96], sizes = [8, 32], strides = [1, 1]} : vector<8x128xf32> to vector<8x32xf32>
    %317 = math.tanh %316 : vector<8x32xf32>
    %318 = vector.extract_strided_slice %315 {offsets = [0, 0], sizes = [8, 32], strides = [1, 1]} : vector<8x96xf32> to vector<8x32xf32>
    %319 = vector.extract_strided_slice %315 {offsets = [0, 32], sizes = [8, 32], strides = [1, 1]} : vector<8x96xf32> to vector<8x32xf32>
    %320 = vector.extract_strided_slice %315 {offsets = [0, 64], sizes = [8, 32], strides = [1, 1]} : vector<8x96xf32> to vector<8x32xf32>
    %321 = arith.mulf %319, %298 : vector<8x32xf32>
    %322 = arith.mulf %318, %317 : vector<8x32xf32>
    %323 = arith.addf %321, %322 : vector<8x32xf32>
    %324 = math.tanh %323 : vector<8x32xf32>
    %325 = arith.mulf %320, %324 : vector<8x32xf32>
    %326 = arith.index_cast %304 : i32 to index
    %c0_120 = arith.constant 0 : index
    %327 = vector.load %arg11[%326, %c0_120] : memref<64x32xf32, #tpu.memory_space<vmem>>, vector<8x32xf32>
    tpu.vector_store %arg11[%326, %c0_120], %325 {strides = array<i32>} : memref<64x32xf32, #tpu.memory_space<vmem>>, vector<8x32xf32>,
    %c4_i32_121 = arith.constant 4 : i32
    %c8_i32_122 = arith.constant 8 : i32
    %328 = arith.muli %c4_i32_121, %c8_i32_122 : i32
    %329 = tpu.assume_multiple %328, 8 : i32
    %330 = arith.index_cast %329 : i32 to index
    %c0_123 = arith.constant 0 : index
    %331 = vector.load %arg15[%330, %c0_123] : memref<64x128xf32, #tpu.memory_space<vmem>>, vector<8x128xf32>
    %c0_124 = arith.constant 0 : index
    %c0_125 = arith.constant 0 : index
    %332 = vector.load %arg7[%c0_124, %c0_125] : memref<32x128xf32, #tpu.memory_space<vmem>>, vector<32x128xf32>
    %cst_126 = arith.constant dense<0.000000e+00> : vector<8x128xf32>
    %333 = tpu.matmul %325, %332, %cst_126 {dimension_numbers = #tpu.dot_dimension_numbers<[1], [0], [0], [1], [0, 0, 1, 1], [], []>} : vector<8x32xf32>, vector<32x128xf32>, vector<8x128xf32> -> vector<8x128xf32>
    %334 = arith.addf %331, %333 : vector<8x128xf32>
    %335 = vector.extract_strided_slice %334 {offsets = [0, 0], sizes = [8, 96], strides = [1, 1]} : vector<8x128xf32> to vector<8x96xf32>
    %336 = arith.negf %335 : vector<8x96xf32>
    %337 = math.exp %336 : vector<8x96xf32>
    %cst_127 = arith.constant 1.000000e+00 : f32
    %338 = vector.broadcast %cst_127 : f32 to vector<8x96xf32>
    %339 = arith.addf %338, %337 : vector<8x96xf32>
    %340 = arith.divf %338, %339 : vector<8x96xf32>
    %341 = vector.extract_strided_slice %334 {offsets = [0, 96], sizes = [8, 32], strides = [1, 1]} : vector<8x128xf32> to vector<8x32xf32>
    %342 = math.tanh %341 : vector<8x32xf32>
    %343 = vector.extract_strided_slice %340 {offsets = [0, 0], sizes = [8, 32], strides = [1, 1]} : vector<8x96xf32> to vector<8x32xf32>
    %344 = vector.extract_strided_slice %340 {offsets = [0, 32], sizes = [8, 32], strides = [1, 1]} : vector<8x96xf32> to vector<8x32xf32>
    %345 = vector.extract_strided_slice %340 {offsets = [0, 64], sizes = [8, 32], strides = [1, 1]} : vector<8x96xf32> to vector<8x32xf32>
    %346 = arith.mulf %344, %323 : vector<8x32xf32>
    %347 = arith.mulf %343, %342 : vector<8x32xf32>
    %348 = arith.addf %346, %347 : vector<8x32xf32>
    %349 = math.tanh %348 : vector<8x32xf32>
    %350 = arith.mulf %345, %349 : vector<8x32xf32>
    %351 = arith.index_cast %329 : i32 to index
    %c0_128 = arith.constant 0 : index
    %352 = vector.load %arg11[%351, %c0_128] : memref<64x32xf32, #tpu.memory_space<vmem>>, vector<8x32xf32>
    tpu.vector_store %arg11[%351, %c0_128], %350 {strides = array<i32>} : memref<64x32xf32, #tpu.memory_space<vmem>>, vector<8x32xf32>,
    %c5_i32_129 = arith.constant 5 : i32
    %c8_i32_130 = arith.constant 8 : i32
    %353 = arith.muli %c5_i32_129, %c8_i32_130 : i32
    %354 = tpu.assume_multiple %353, 8 : i32
    %355 = arith.index_cast %354 : i32 to index
    %c0_131 = arith.constant 0 : index
    %356 = vector.load %arg15[%355, %c0_131] : memref<64x128xf32, #tpu.memory_space<vmem>>, vector<8x128xf32>
    %c0_132 = arith.constant 0 : index
    %c0_133 = arith.constant 0 : index
    %357 = vector.load %arg7[%c0_132, %c0_133] : memref<32x128xf32, #tpu.memory_space<vmem>>, vector<32x128xf32>
    %cst_134 = arith.constant dense<0.000000e+00> : vector<8x128xf32>
    %358 = tpu.matmul %350, %357, %cst_134 {dimension_numbers = #tpu.dot_dimension_numbers<[1], [0], [0], [1], [0, 0, 1, 1], [], []>} : vector<8x32xf32>, vector<32x128xf32>, vector<8x128xf32> -> vector<8x128xf32>
    %359 = arith.addf %356, %358 : vector<8x128xf32>
    %360 = vector.extract_strided_slice %359 {offsets = [0, 0], sizes = [8, 96], strides = [1, 1]} : vector<8x128xf32> to vector<8x96xf32>
    %361 = arith.negf %360 : vector<8x96xf32>
    %362 = math.exp %361 : vector<8x96xf32>
    %cst_135 = arith.constant 1.000000e+00 : f32
    %363 = vector.broadcast %cst_135 : f32 to vector<8x96xf32>
    %364 = arith.addf %363, %362 : vector<8x96xf32>
    %365 = arith.divf %363, %364 : vector<8x96xf32>
    %366 = vector.extract_strided_slice %359 {offsets = [0, 96], sizes = [8, 32], strides = [1, 1]} : vector<8x128xf32> to vector<8x32xf32>
    %367 = math.tanh %366 : vector<8x32xf32>
    %368 = vector.extract_strided_slice %365 {offsets = [0, 0], sizes = [8, 32], strides = [1, 1]} : vector<8x96xf32> to vector<8x32xf32>
    %369 = vector.extract_strided_slice %365 {offsets = [0, 32], sizes = [8, 32], strides = [1, 1]} : vector<8x96xf32> to vector<8x32xf32>
    %370 = vector.extract_strided_slice %365 {offsets = [0, 64], sizes = [8, 32], strides = [1, 1]} : vector<8x96xf32> to vector<8x32xf32>
    %371 = arith.mulf %369, %348 : vector<8x32xf32>
    %372 = arith.mulf %368, %367 : vector<8x32xf32>
    %373 = arith.addf %371, %372 : vector<8x32xf32>
    %374 = math.tanh %373 : vector<8x32xf32>
    %375 = arith.mulf %370, %374 : vector<8x32xf32>
    %376 = arith.index_cast %354 : i32 to index
    %c0_136 = arith.constant 0 : index
    %377 = vector.load %arg11[%376, %c0_136] : memref<64x32xf32, #tpu.memory_space<vmem>>, vector<8x32xf32>
    tpu.vector_store %arg11[%376, %c0_136], %375 {strides = array<i32>} : memref<64x32xf32, #tpu.memory_space<vmem>>, vector<8x32xf32>,
    %c6_i32_137 = arith.constant 6 : i32
    %c8_i32_138 = arith.constant 8 : i32
    %378 = arith.muli %c6_i32_137, %c8_i32_138 : i32
    %379 = tpu.assume_multiple %378, 8 : i32
    %380 = arith.index_cast %379 : i32 to index
    %c0_139 = arith.constant 0 : index
    %381 = vector.load %arg15[%380, %c0_139] : memref<64x128xf32, #tpu.memory_space<vmem>>, vector<8x128xf32>
    %c0_140 = arith.constant 0 : index
    %c0_141 = arith.constant 0 : index
    %382 = vector.load %arg7[%c0_140, %c0_141] : memref<32x128xf32, #tpu.memory_space<vmem>>, vector<32x128xf32>
    %cst_142 = arith.constant dense<0.000000e+00> : vector<8x128xf32>
    %383 = tpu.matmul %375, %382, %cst_142 {dimension_numbers = #tpu.dot_dimension_numbers<[1], [0], [0], [1], [0, 0, 1, 1], [], []>} : vector<8x32xf32>, vector<32x128xf32>, vector<8x128xf32> -> vector<8x128xf32>
    %384 = arith.addf %381, %383 : vector<8x128xf32>
    %385 = vector.extract_strided_slice %384 {offsets = [0, 0], sizes = [8, 96], strides = [1, 1]} : vector<8x128xf32> to vector<8x96xf32>
    %386 = arith.negf %385 : vector<8x96xf32>
    %387 = math.exp %386 : vector<8x96xf32>
    %cst_143 = arith.constant 1.000000e+00 : f32
    %388 = vector.broadcast %cst_143 : f32 to vector<8x96xf32>
    %389 = arith.addf %388, %387 : vector<8x96xf32>
    %390 = arith.divf %388, %389 : vector<8x96xf32>
    %391 = vector.extract_strided_slice %384 {offsets = [0, 96], sizes = [8, 32], strides = [1, 1]} : vector<8x128xf32> to vector<8x32xf32>
    %392 = math.tanh %391 : vector<8x32xf32>
    %393 = vector.extract_strided_slice %390 {offsets = [0, 0], sizes = [8, 32], strides = [1, 1]} : vector<8x96xf32> to vector<8x32xf32>
    %394 = vector.extract_strided_slice %390 {offsets = [0, 32], sizes = [8, 32], strides = [1, 1]} : vector<8x96xf32> to vector<8x32xf32>
    %395 = vector.extract_strided_slice %390 {offsets = [0, 64], sizes = [8, 32], strides = [1, 1]} : vector<8x96xf32> to vector<8x32xf32>
    %396 = arith.mulf %394, %373 : vector<8x32xf32>
    %397 = arith.mulf %393, %392 : vector<8x32xf32>
    %398 = arith.addf %396, %397 : vector<8x32xf32>
    %399 = math.tanh %398 : vector<8x32xf32>
    %400 = arith.mulf %395, %399 : vector<8x32xf32>
    %401 = arith.index_cast %379 : i32 to index
    %c0_144 = arith.constant 0 : index
    %402 = vector.load %arg11[%401, %c0_144] : memref<64x32xf32, #tpu.memory_space<vmem>>, vector<8x32xf32>
    tpu.vector_store %arg11[%401, %c0_144], %400 {strides = array<i32>} : memref<64x32xf32, #tpu.memory_space<vmem>>, vector<8x32xf32>,
    %c7_i32_145 = arith.constant 7 : i32
    %c8_i32_146 = arith.constant 8 : i32
    %403 = arith.muli %c7_i32_145, %c8_i32_146 : i32
    %404 = tpu.assume_multiple %403, 8 : i32
    %405 = arith.index_cast %404 : i32 to index
    %c0_147 = arith.constant 0 : index
    %406 = vector.load %arg15[%405, %c0_147] : memref<64x128xf32, #tpu.memory_space<vmem>>, vector<8x128xf32>
    %c0_148 = arith.constant 0 : index
    %c0_149 = arith.constant 0 : index
    %407 = vector.load %arg7[%c0_148, %c0_149] : memref<32x128xf32, #tpu.memory_space<vmem>>, vector<32x128xf32>
    %cst_150 = arith.constant dense<0.000000e+00> : vector<8x128xf32>
    %408 = tpu.matmul %400, %407, %cst_150 {dimension_numbers = #tpu.dot_dimension_numbers<[1], [0], [0], [1], [0, 0, 1, 1], [], []>} : vector<8x32xf32>, vector<32x128xf32>, vector<8x128xf32> -> vector<8x128xf32>
    %409 = arith.addf %406, %408 : vector<8x128xf32>
    %410 = vector.extract_strided_slice %409 {offsets = [0, 0], sizes = [8, 96], strides = [1, 1]} : vector<8x128xf32> to vector<8x96xf32>
    %411 = arith.negf %410 : vector<8x96xf32>
    %412 = math.exp %411 : vector<8x96xf32>
    %cst_151 = arith.constant 1.000000e+00 : f32
    %413 = vector.broadcast %cst_151 : f32 to vector<8x96xf32>
    %414 = arith.addf %413, %412 : vector<8x96xf32>
    %415 = arith.divf %413, %414 : vector<8x96xf32>
    %416 = vector.extract_strided_slice %409 {offsets = [0, 96], sizes = [8, 32], strides = [1, 1]} : vector<8x128xf32> to vector<8x32xf32>
    %417 = math.tanh %416 : vector<8x32xf32>
    %418 = vector.extract_strided_slice %415 {offsets = [0, 0], sizes = [8, 32], strides = [1, 1]} : vector<8x96xf32> to vector<8x32xf32>
    %419 = vector.extract_strided_slice %415 {offsets = [0, 32], sizes = [8, 32], strides = [1, 1]} : vector<8x96xf32> to vector<8x32xf32>
    %420 = vector.extract_strided_slice %415 {offsets = [0, 64], sizes = [8, 32], strides = [1, 1]} : vector<8x96xf32> to vector<8x32xf32>
    %421 = arith.mulf %419, %398 : vector<8x32xf32>
    %422 = arith.mulf %418, %417 : vector<8x32xf32>
    %423 = arith.addf %421, %422 : vector<8x32xf32>
    %424 = math.tanh %423 : vector<8x32xf32>
    %425 = arith.mulf %420, %424 : vector<8x32xf32>
    %426 = arith.index_cast %404 : i32 to index
    %c0_152 = arith.constant 0 : index
    %427 = vector.load %arg11[%426, %c0_152] : memref<64x32xf32, #tpu.memory_space<vmem>>, vector<8x32xf32>
    tpu.vector_store %arg11[%426, %c0_152], %425 {strides = array<i32>} : memref<64x32xf32, #tpu.memory_space<vmem>>, vector<8x32xf32>,
    %c8_i32_153 = arith.constant 8 : i32
    %c1_154 = arith.constant 1 : index
    %c0_155 = arith.constant 0 : index
    %c0_156 = arith.constant 0 : index
    %428 = vector.load %arg13[%c1_154, %c0_155, %c0_156] : memref<2x8x32xf32, #tpu.memory_space<vmem>>, vector<1x8x32xf32>
    %429 = vector.shape_cast %428 : vector<1x8x32xf32> to vector<8x32xf32>
    %430 = vector.shape_cast %425 : vector<8x32xf32> to vector<1x8x32xf32>
    tpu.vector_store %arg13[%c1_154, %c0_155, %c0_156], %430 {strides = array<i32>} : memref<2x8x32xf32, #tpu.memory_space<vmem>>, vector<1x8x32xf32>,
    %c1_157 = arith.constant 1 : index
    %c0_158 = arith.constant 0 : index
    %c0_159 = arith.constant 0 : index
    %431 = vector.load %arg14[%c1_157, %c0_158, %c0_159] : memref<2x8x32xf32, #tpu.memory_space<vmem>>, vector<1x8x32xf32>
    %432 = vector.shape_cast %431 : vector<1x8x32xf32> to vector<8x32xf32>
    %433 = vector.shape_cast %423 : vector<8x32xf32> to vector<1x8x32xf32>
    tpu.vector_store %arg14[%c1_157, %c0_158, %c0_159], %433 {strides = array<i32>} : memref<2x8x32xf32, #tpu.memory_space<vmem>>, vector<1x8x32xf32>,
    %c0_160 = arith.constant 0 : index
    %c0_161 = arith.constant 0 : index
    %434 = vector.load %arg9[%c0_160, %c0_161] : memref<1x32xf32, #tpu.memory_space<vmem>>, vector<1x32xf32>
    %435 = vector.broadcast %434 : vector<1x32xf32> to vector<8x32xf32>
    %436 = arith.mulf %425, %435 : vector<8x32xf32>
    %cst_162 = arith.constant dense<0.000000e+00> : vector<8xf32>
    %437 = vector.multi_reduction <add>, %436, %cst_162 [1] : vector<8x32xf32> to vector<8xf32>
    %438 = vector.shape_cast %437 : vector<8xf32> to vector<8x1xf32>
    %c0_163 = arith.constant 0 : index
    %c0_164 = arith.constant 0 : index
    %439 = vector.load %arg10[%c0_163, %c0_164] : memref<1x1xf32, #tpu.memory_space<vmem>>, vector<1x1xf32>
    %440 = vector.broadcast %439 : vector<1x1xf32> to vector<8x1xf32>
    %441 = arith.addf %438, %440 : vector<8x1xf32>
    %c0_165 = arith.constant 0 : index
    %c0_166 = arith.constant 0 : index
    %442 = vector.load %arg12[%c0_165, %c0_166] : memref<8x1xf32, #tpu.memory_space<vmem>>, vector<8x1xf32>
    tpu.vector_store %arg12[%c0_165, %c0_166], %441 {strides = array<i32>} : memref<8x1xf32, #tpu.memory_space<vmem>>, vector<8x1xf32>,
    return
  }
}

</mosaic_0001>

<bundles_post_ra>
// kernel: encoder_forward.1
= control target key start
LH: loop header
LB: loop body
LE: loop exit
PB: predicated region body
PF: predicated region fallthrough
CT: control target
= control target key end

     0   :  { %vm85_vm0 = vcmask 1044480   ;;  %vm60_vm1 = vcmask 39936   ;;  %v2778_v0 = vmov 0.0|0.0   ;;  %vm2779_vm2 = vmmov 0   ;;  %s2781_s29 = smov 32   ;;  %s3273_s4 = inlined_call_operand.vmem [shape: f32[32,128], index: 4, kind: input, shape index: {}]   ;;  %s3274_s3 = inlined_call_operand.vmem [shape: f32[5,128], index: 3, kind: input, shape index: {}]   ;;  %s3275_s0 = inlined_call_operand.vmem [shape: f32[64,5], index: 0, kind: input, shape index: {}]   ;;  %s3276_s1 = inlined_call_operand.vmem [shape: f32[2,8,32], index: 1, kind: input, shape index: {}]   ;;  %s3277_s5 = inlined_call_operand.vmem [shape: f32[1,128], index: 5, kind: input, shape index: {}]   ;;  %s3278_s2 = inlined_call_operand.vmem [shape: f32[2,8,32], index: 2, kind: input, shape index: {}]   ;;  %s3279_s6 = inlined_call_operand.vmem [shape: f32[32,128], index: 6, kind: input, shape index: {}]   ;;  %s3280_s7 = inlined_call_operand.vmem [shape: f32[32,128], index: 7, kind: input, shape index: {}]   ;;  %s3281_s8 = inlined_call_operand.vmem [shape: f32[1,128], index: 8, kind: input, shape index: {}]   ;;  %s3282_s11 = inlined_call_operand.vmem [shape: f32[64,32], index: 11, kind: output, shape index: {0}]   ;;  %s3283_s13 = inlined_call_operand.vmem [shape: f32[2,8,32], index: 13, kind: output, shape index: {2}]   ;;  %s3284_s9 = inlined_call_operand.vmem [shape: f32[1,32], index: 9, kind: input, shape index: {}]   ;;  %s3285_s10 = inlined_call_operand.<no memory space> [shape: f32[1,1], index: 10, kind: input, shape index: {}]   ;;  %s3286_s14 = inlined_call_operand.vmem [shape: f32[2,8,32], index: 14, kind: output, shape index: {3}]   ;;  %s3287_s12 = inlined_call_operand.vmem [shape: f32[8,1], index: 12, kind: output, shape index: {1}]  }
   0x1   :  { %2540 = vmatprep.subr.bf16.mxu1 %v2778_v0  ;;  %v205_v1 = vld [vmem:[%s3273_s4] sm:$0xff]  ;;  %v206_v2 = vld [vmem:[%s3273_s4 + $0x8] sm:$0xff]  ;;  %v207_v7 = vld [vmem:[%s3273_s4 + $0x10] sm:$0xff]  ;;  %v2780_v8 = vmov 0.0   ;;  %vm209_vm3 = vcmask 261120   ;;  %vm2147_vm4 = vcmask 7168  }
   0x2   :  { %v52_v3 = vld [vmem:[%s3274_s3] sm:$0x1f]  ;;  %v2869_v4 = vpack.c.bf16 %v206_v2, %v205_v1  ;;  %v45_v6 = vld [vmem:[%s3275_s0 + $0x8] sm:$0xff]  ;;  %2352 = vmatprep.mubr.msk.f32.mxu1 %vm2779_vm2, %v2780_v8  ;;  %v208_v9 = vld [vmem:[%s3273_s4 + $0x18] sm:$0xff] }
   0x3   :  { %2330 = vmatprep.subr.msk.mxu0 %vm85_vm0, %v52_v3  ;;  %v44_v5 = vld [vmem:[%s3275_s0] sm:$0xff]  ;;  %v2890_v10 = vpack.c.bf16 %v208_v9, %v207_v7  ;;  %v46_v49 = vld [vmem:[%s3275_s0 + $0x10] sm:$0xff]  ;;  %v47_v50 = vld [vmem:[%s3275_s0 + $0x18] sm:$0xff] }
   0x4   :  { %2331 = vmatpush3.msk.msra.mxu0 %vm85_vm0, %v52_v3  ;;  %2332 = vmatprep.mubr.msk.f32.mxu0 %vm60_vm1, %v44_v5  ;;  %v202_v11 = vld [vmem:[%s3276_s1] sm:$0xff]  ;;  %v49_v52 = vld [vmem:[%s3275_s0 + $0x28] sm:$0xff]  ;;  %v50_v53 = vld [vmem:[%s3275_s0 + $0x30] sm:$0xff] }
   0x5   :  { %2542 = vmatpush3.bf16.msra.mxu1 %v2869_v4  ;;  %2333 = vmatmul.mubr.msk.f32.vlgmr.msra.gmra.mrb[0].mxu0 %vm60_vm1, %v45_v6  ;;  %v2913_v13 = vld [vmem:[%s3277_s5] ss:$0 sm:$0xff]  ;;  %s2782_s5 = smov 64   ;;  %v51_v54 = vld [vmem:[%s3275_s0 + $0x38] sm:$0xff] }
   0x6   :  { %2543 = vmatprep.subr.bf16.mxu1 %v2778_v0  ;;  %2552 = vmatprep.subr.bf16.mxu0 %v2778_v0  ;;  %v203_v20 = vld [vmem:[%s3278_s2] sm:$0xff] }
   0x7   :  { %2554 = vmatpush3.bf16.msra.mxu0 %v2869_v4  ;;  %v48_v51 = vld [vmem:[%s3275_s0 + $0x20] sm:$0xff]  ;;  %2335 = vmatprep.mubr.msk.f32.mxu0 %vm60_vm1, %v46_v49 }
   0x8   :  { %2555 = vmatprep.subr.bf16.mxu0 %v2778_v0 }
   0x9   :  { %2545 = vmatpush3.bf16.msra.mxu1 %v2890_v10  ;;  %2336 = vmatmul.mubr.msk.f32.gmra.mrb[2].mxu0 %vm60_vm1, %v47_v50 }
   0xa   :  { %2546 = vmatprep.subr.bf16.mxu1 %v2778_v0  ;;  %2338 = vmatprep.mubr.msk.f32.mxu0 %vm60_vm1, %v48_v51 }
   0xb   :  { %2557 = vmatpush3.bf16.msra.mxu0 %v2890_v10 }
   0xc   :  { %2353 = vmatmul.mubr.msk.f32.vlgmr.msra.gmra.mrb[0].mxu1 %vm209_vm3, %v202_v11  ;;  %2564 = vmatprep.subr.bf16.mxu0 %v2778_v0 }
   0xd   :  { %2548 = vmatpush3.bf16.msra.mxu1 %v2869_v4  ;;  %2363 = vmatprep.mubr.msk.f32.mxu1 %vm2779_vm2, %v2780_v8 }
   0xe   :  { %2549 = vmatprep.subr.bf16.mxu1 %v2778_v0  ;;  %2339 = vmatmul.mubr.msk.f32.gmra.mrb[4].mxu0 %vm60_vm1, %v49_v52 }
   0xf   :  { %2341 = vmatprep.mubr.msk.f32.mxu0 %vm60_vm1, %v50_v53 }
  0x11   :  { %2551 = vmatpush3.bf16.msra.mxu1 %v2890_v10 }
  0x12   :  { %2558 = vmatprep.subr.bf16.mxu1 %v2778_v0  ;;  %2342 = vmatmul.mubr.msk.f32.gmra.mrb[6].mxu0 %vm60_vm1, %v51_v54 }
  0x13   :  { %2374 = vmatprep.mubr.msk.f32.mxu0 %vm2779_vm2, %v2780_v8 }
  0xd8   :  { %v2334_v12 = vpop.f32.mrb[0].mxu0 }
  0xd9   :  { %v155_v14 = vpop.f32.mrb[1].mxu0  ;;  %v161_v35 = vadd.f32 %v2334_v12, %v2913_v13 }
  0xda   :  { %v156_v15 = vadd.f32 %v2913_v13, %v155_v14 }
  0xdc   :  { %v2337_v58 = vpop.f32.mrb[2].mxu0 }
  0xdd   :  { %v165_v59 = vpop.f32.mrb[3].mxu0 }
  0xde   :  { %v166_v2 = vadd.f32 %v2913_v13, %v165_v59 }
  0xdf   :  { %v279_v16 = vpop.f32.mrb[0].mxu1 }
  0xe0   :  { %v283_v17 = vadd.f32 %v279_v16, %v156_v15  ;;  %v2354_v18 = vpop.f32.mrb[1].mxu1 }
  0xe1   :  { %v2963_v60 = vpop.f32.mrb[4].mxu0 }
  0xe2   :  { %2650 = vtanh.f32 %v283_v17  ;;  %v2176_v21 = vmul.f32 -1.442695, %v283_v17  ;;  %v2965_v61 = vpop.f32.mrb[5].mxu0 }
  0xe4   :  { %2652 = vpow2.f32 %v2176_v21 }
  0xe5   :  { %v2967_v62 = vpop.f32.mrb[6].mxu0 }
  0xe6   :  { %v2969_v63 = vpop.f32.mrb[7].mxu0 }
  0xec   :  { %v2651_v19 = vpop.eup %2650 }
  0xed   :  { %297 = vrot.lane.b32.xlu0 %v2651_v19, %s2781_s29 }
  0xee   :  { %v2653_v22 = vpop.eup %2652 }
  0xef   :  { %v287_v23 = vadd.f32 1.0, %v2653_v22 }
  0xf1   :  { %292 = vrot.lane.b32.xlu0 %v203_v20, %s2781_s29  ;;  %2654 = vrcp.f32 %v287_v23 }
  0xfb   :  { %v2655_v24 = vpop.eup %2654 }
 0x15f   :  { %v298_v25 = vpop.permute.xlu0 %297 }
 0x160   :  { %v300_v26 = vmul.f32 %v2655_v24, %v298_v25 }
 0x162   :  { %302 = vrot.lane.b32.xlu1 %v300_v26, %s2781_s29 }
 0x163   :  { %v293_v27 = vpop.permute.xlu0 %292 }
 0x164   :  { %v295_v28 = vmul.f32 %v2655_v24, %v293_v27 }
 0x1d4   :  { %v303_v29 = vpop.permute.xlu1 %302 }
 0x1d5   :  { %v305_v30 = vadd.f32 %v303_v29, %v295_v28 }
 0x1d7   :  { %2656 = vtanh.f32 %v305_v30 }
 0x1e1   :  { %v2657_v31 = vpop.eup %2656 }
 0x1e2   :  { %308 = vrot.lane.b32.xlu1 %v2657_v31, %s2781_s29 }
 0x254   :  { %v309_v32 = vpop.permute.xlu1 %308 }
 0x255   :  { %v311_v33 = vmul.f32 %v2655_v24, %v309_v32  ;;  %v171_v24 = vadd.f32 %v2337_v58, %v2913_v13 }
 0x257   :  { %313 = vrot.lane.b32.xlu0 %v311_v33, %s2782_s5 }
 0x2c9   :  { %v314_v34 = vpop.permute.xlu0 %313 }
 0x2ca   :  { %316 = vst.msk [vmem:[#allocation3] sm:$0xff] %vm209_vm3, %v314_v34  ;;  %2364 = vmatmul.mubr.msk.f32.vlgmr.msra.gmra.mrb[2].mxu1 %vm209_vm3, %v314_v34 }
 0x2cb   :  { %2560 = vmatpush3.bf16.msra.mxu1 %v2869_v4  ;;  %2385 = vmatprep.mubr.msk.f32.mxu1 %vm2779_vm2, %v2780_v8 }
 0x2cc   :  { %2561 = vmatprep.subr.bf16.mxu1 %v2778_v0 }
 0x2cf   :  { %2563 = vmatpush3.bf16.msra.mxu1 %v2890_v10 }
 0x2d0   :  { %2570 = vmatprep.subr.bf16.mxu1 %v2778_v0 }
 0x39d   :  { %v391_v36 = vpop.f32.mrb[2].mxu1 }
 0x39e   :  { %v395_v37 = vadd.f32 %v391_v36, %v161_v35  ;;  %v2365_v38 = vpop.f32.mrb[3].mxu1 }
 0x3a0   :  { %2658 = vtanh.f32 %v395_v37  ;;  %v2178_v40 = vmul.f32 -1.442695, %v395_v37 }
 0x3a2   :  { %2660 = vpow2.f32 %v2178_v40 }
 0x3aa   :  { %v2659_v39 = vpop.eup %2658 }
 0x3ab   :  { %405 = vrot.lane.b32.xlu1 %v2659_v39, %s2781_s29 }
 0x3ac   :  { %v2661_v41 = vpop.eup %2660 }
 0x3ad   :  { %v399_v42 = vadd.f32 1.0, %v2661_v41 }
 0x3af   :  { %2662 = vrcp.f32 %v399_v42  ;;  %v176_v42 = vadd.f32 %v2913_v13, %v2965_v61  ;;  %v181_v61 = vadd.f32 %v2963_v60, %v2913_v13 }
 0x3b9   :  { %v2663_v43 = vpop.eup %2662 }
 0x3ba   :  { %v403_v46 = vmul.f32 %v2663_v43, %v305_v30 }
 0x41d   :  { %v406_v44 = vpop.permute.xlu1 %405 }
 0x41e   :  { %v408_v45 = vmul.f32 %v2663_v43, %v406_v44 }
 0x420   :  { %410 = vrot.lane.b32.xlu0 %v408_v45, %s2781_s29 }
 0x492   :  { %v411_v47 = vpop.permute.xlu0 %410 }
 0x493   :  { %v413_v48 = vadd.f32 %v411_v47, %v403_v46 }
 0x495   :  { %2664 = vtanh.f32 %v413_v48 }
 0x49f   :  { %v2665_v55 = vpop.eup %2664 }
 0x4a0   :  { %416 = vrot.lane.b32.xlu1 %v2665_v55, %s2781_s29 }
 0x512   :  { %v417_v56 = vpop.permute.xlu1 %416 }
 0x513   :  { %v419_v57 = vmul.f32 %v2663_v43, %v417_v56 }
 0x515   :  { %421 = vrot.lane.b32.xlu0 %v419_v57, %s2782_s5 }
 0x587   :  { %v422_v1 = vpop.permute.xlu0 %421 }
 0x588   :  { %425 = vst.msk [vmem:[#allocation3 + $0x8] sm:$0xff] %vm209_vm3, %v422_v1  ;;  %2375 = vmatmul.mubr.msk.f32.vlgmr.msra.gmra.mrb[8].mxu0 %vm209_vm3, %v422_v1 }
 0x589   :  { %2566 = vmatpush3.bf16.msra.mxu0 %v2869_v4  ;;  %2396 = vmatprep.mubr.msk.f32.mxu0 %vm2779_vm2, %v2780_v8 }
 0x58a   :  { %2567 = vmatprep.subr.bf16.mxu0 %v2778_v0 }
 0x58d   :  { %2569 = vmatpush3.bf16.msra.mxu0 %v2890_v10 }
 0x58e   :  { %2576 = vmatprep.subr.bf16.mxu0 %v2778_v0 }
 0x65b   :  { %v500_v3 = vpop.f32.mrb[8].mxu0 }
 0x65c   :  { %v504_v5 = vadd.f32 %v500_v3, %v166_v2  ;;  %v2376_v6 = vpop.f32.mrb[9].mxu0 }
 0x65e   :  { %2666 = vtanh.f32 %v504_v5  ;;  %v2180_v9 = vmul.f32 -1.442695, %v504_v5 }
 0x660   :  { %2668 = vpow2.f32 %v2180_v9 }
 0x668   :  { %v2667_v7 = vpop.eup %2666 }
 0x669   :  { %514 = vrot.lane.b32.xlu1 %v2667_v7, %s2781_s29 }
 0x66a   :  { %v2669_v11 = vpop.eup %2668 }
 0x66b   :  { %v508_v12 = vadd.f32 1.0, %v2669_v11 }
 0x66d   :  { %2670 = vrcp.f32 %v508_v12 }
 0x677   :  { %v2671_v14 = vpop.eup %2670 }
 0x678   :  { %v512_v17 = vmul.f32 %v2671_v14, %v413_v48 }
 0x6db   :  { %v515_v15 = vpop.permute.xlu1 %514 }
 0x6dc   :  { %v517_v16 = vmul.f32 %v2671_v14, %v515_v15  ;;  %v1094_v15 = vld [vmem:[%s3279_s6] sm:$0xff] }
 0x6de   :  { %519 = vrot.lane.b32.xlu0 %v517_v16, %s2781_s29  ;;  %v1095_v16 = vld [vmem:[%s3279_s6 + $0x8] sm:$0xff] }
 0x750   :  { %v520_v18 = vpop.permute.xlu0 %519 }
 0x751   :  { %v522_v19 = vadd.f32 %v520_v18, %v512_v17  ;;  %v2588_v17 = vpack.c.bf16 %v1095_v16, %v1094_v15 }
 0x753   :  { %2672 = vtanh.f32 %v522_v19 }
 0x75d   :  { %v2673_v20 = vpop.eup %2672 }
 0x75e   :  { %525 = vrot.lane.b32.xlu1 %v2673_v20, %s2781_s29 }
 0x7d0   :  { %v526_v21 = vpop.permute.xlu1 %525 }
 0x7d1   :  { %v528_v22 = vmul.f32 %v2671_v14, %v526_v21  ;;  %v1096_v21 = vld [vmem:[%s3279_s6 + $0x10] sm:$0xff] }
 0x7d3   :  { %530 = vrot.lane.b32.xlu0 %v528_v22, %s2782_s5  ;;  %v1097_v22 = vld [vmem:[%s3279_s6 + $0x18] sm:$0xff] }
 0x845   :  { %v531_v23 = vpop.permute.xlu0 %530 }
 0x846   :  { %534 = vst.msk [vmem:[#allocation3 + $0x10] sm:$0xff] %vm209_vm3, %v531_v23  ;;  %2386 = vmatmul.mubr.msk.f32.vlgmr.msra.gmra.mrb[4].mxu1 %vm209_vm3, %v531_v23  ;;  %v2592_v23 = vpack.c.bf16 %v1097_v22, %v1096_v21 }
 0x847   :  { %2572 = vmatpush3.bf16.msra.mxu1 %v2869_v4  ;;  %2407 = vmatprep.mubr.msk.f32.mxu1 %vm2779_vm2, %v2780_v8 }
 0x848   :  { %2573 = vmatprep.subr.bf16.mxu1 %v2778_v0 }
 0x84b   :  { %2575 = vmatpush3.bf16.msra.mxu1 %v2890_v10 }
 0x84c   :  { %2582 = vmatprep.subr.bf16.mxu1 %v2778_v0 }
 0x919   :  { %v609_v25 = vpop.f32.mrb[4].mxu1 }
 0x91a   :  { %v613_v26 = vadd.f32 %v609_v25, %v171_v24  ;;  %v2387_v27 = vpop.f32.mrb[5].mxu1  ;;  %v1086_v25 = vld [vmem:[#allocation3] sm:$0xff] }
 0x91b   :  { %v1088_v27 = vld [vmem:[#allocation3 + $0x10] sm:$0xff] }
 0x91c   :  { %2674 = vtanh.f32 %v613_v26  ;;  %v2182_v29 = vmul.f32 -1.442695, %v613_v26  ;;  %v1087_v26 = vld [vmem:[#allocation3 + $0x8] sm:$0xff] }
 0x91e   :  { %2676 = vpow2.f32 %v2182_v29 }
 0x926   :  { %v2675_v28 = vpop.eup %2674 }
 0x927   :  { %623 = vrot.lane.b32.xlu1 %v2675_v28, %s2781_s29 }
 0x928   :  { %v2677_v30 = vpop.eup %2676 }
 0x929   :  { %v617_v31 = vadd.f32 1.0, %v2677_v30 }
 0x92b   :  { %2678 = vrcp.f32 %v617_v31  ;;  %v186_v31 = vadd.f32 %v2913_v13, %v2969_v63 }
 0x935   :  { %v2679_v32 = vpop.eup %2678 }
 0x936   :  { %v621_v35 = vmul.f32 %v2679_v32, %v522_v19 }
 0x999   :  { %v624_v33 = vpop.permute.xlu1 %623 }
 0x99a   :  { %v626_v34 = vmul.f32 %v2679_v32, %v624_v33 }
 0x99c   :  { %628 = vrot.lane.b32.xlu0 %v626_v34, %s2781_s29 }
 0xa0e   :  { %v629_v36 = vpop.permute.xlu0 %628 }
 0xa0f   :  { %v631_v37 = vadd.f32 %v629_v36, %v621_v35 }
 0xa11   :  { %2680 = vtanh.f32 %v631_v37 }
 0xa1b   :  { %v2681_v38 = vpop.eup %2680 }
 0xa1c   :  { %634 = vrot.lane.b32.xlu1 %v2681_v38, %s2781_s29 }
 0xa8e   :  { %v635_v39 = vpop.permute.xlu1 %634 }
 0xa8f   :  { %v637_v40 = vmul.f32 %v2679_v32, %v635_v39 }
 0xa91   :  { %639 = vrot.lane.b32.xlu0 %v637_v40, %s2782_s5 }
 0xb03   :  { %v640_v41 = vpop.permute.xlu0 %639 }
 0xb04   :  { %643 = vst.msk [vmem:[#allocation3 + $0x18] sm:$0xff] %vm209_vm3, %v640_v41  ;;  %2397 = vmatmul.mubr.msk.f32.vlgmr.msra.gmra.mrb[10].mxu0 %vm209_vm3, %v640_v41 }
 0xb05   :  { %2578 = vmatpush3.bf16.msra.mxu0 %v2869_v4  ;;  %2418 = vmatprep.mubr.msk.f32.mxu0 %vm2779_vm2, %v2780_v8 }
 0xb06   :  { %2579 = vmatprep.subr.bf16.mxu0 %v2778_v0 }
 0xb09   :  { %2581 = vmatpush3.bf16.msra.mxu0 %v2890_v10 }
 0xb0a   :  { %2589 = vmatprep.subr.bf16.mxu0 %v2588_v17 }
 0xb0b   :  { %v1089_v28 = vld [vmem:[#allocation3 + $0x18] sm:$0xff] }
 0xbd7   :  { %v718_v43 = vpop.f32.mrb[10].mxu0 }
 0xbd8   :  { %v722_v44 = vadd.f32 %v718_v43, %v176_v42  ;;  %v2398_v45 = vpop.f32.mrb[11].mxu0 }
 0xbda   :  { %2682 = vtanh.f32 %v722_v44  ;;  %v2184_v47 = vmul.f32 -1.442695, %v722_v44 }
 0xbdc   :  { %2684 = vpow2.f32 %v2184_v47 }
 0xbe4   :  { %v2683_v46 = vpop.eup %2682 }
 0xbe5   :  { %732 = vrot.lane.b32.xlu1 %v2683_v46, %s2781_s29 }
 0xbe6   :  { %v2685_v48 = vpop.eup %2684 }
 0xbe7   :  { %v726_v49 = vadd.f32 1.0, %v2685_v48 }
 0xbe9   :  { %2686 = vrcp.f32 %v726_v49 }
 0xbf3   :  { %v2687_v50 = vpop.eup %2686 }
 0xbf4   :  { %v730_v53 = vmul.f32 %v2687_v50, %v631_v37 }
 0xc57   :  { %v733_v51 = vpop.permute.xlu1 %732 }
 0xc58   :  { %v735_v52 = vmul.f32 %v2687_v50, %v733_v51  ;;  %v1247_v51 = vld [vmem:[%s3280_s7] sm:$0xff] }
 0xc5a   :  { %737 = vrot.lane.b32.xlu0 %v735_v52, %s2781_s29  ;;  %v1248_v52 = vld [vmem:[%s3280_s7 + $0x8] sm:$0xff] }
 0xccc   :  { %v738_v54 = vpop.permute.xlu0 %737 }
 0xccd   :  { %v740_v55 = vadd.f32 %v738_v54, %v730_v53  ;;  %v3069_v53 = vpack.c.bf16 %v1248_v52, %v1247_v51  ;;  %v1249_v54 = vld [vmem:[%s3280_s7 + $0x10] sm:$0xff] }
 0xccf   :  { %2688 = vtanh.f32 %v740_v55 }
 0xcd9   :  { %v2689_v56 = vpop.eup %2688 }
 0xcda   :  { %743 = vrot.lane.b32.xlu1 %v2689_v56, %s2781_s29 }
 0xd4c   :  { %v744_v57 = vpop.permute.xlu1 %743 }
 0xd4d   :  { %v746_v58 = vmul.f32 %v2687_v50, %v744_v57 }
 0xd4f   :  { %748 = vrot.lane.b32.xlu0 %v746_v58, %s2782_s5 }
 0xdc1   :  { %v749_v59 = vpop.permute.xlu0 %748 }
 0xdc2   :  { %752 = vst.msk [vmem:[#allocation3 + $0x20] sm:$0xff] %vm209_vm3, %v749_v59  ;;  %2408 = vmatmul.mubr.msk.f32.vlgmr.msra.gmra.mrb[6].mxu1 %vm209_vm3, %v749_v59  ;;  %v2201_v59 = vld [vmem:[%s3278_s2 + $0x8] sm:$0xff] }
 0xdc3   :  { %2584 = vmatpush3.bf16.msra.mxu1 %v2869_v4  ;;  %2429 = vmatprep.mubr.msk.f32.mxu1 %vm2779_vm2, %v2780_v8 }
 0xdc4   :  { %2585 = vmatprep.subr.bf16.mxu1 %v2778_v0 }
 0xdc7   :  { %2587 = vmatpush3.bf16.msra.mxu1 %v2890_v10 }
 0xdc8   :  { %2596 = vmatprep.subr.bf16.mxu1 %v2778_v0 }
 0xdc9   :  { %v1090_v29 = vld [vmem:[#allocation3 + $0x20] sm:$0xff] }
 0xe95   :  { %v827_v1 = vpop.f32.mrb[6].mxu1 }
 0xe96   :  { %v831_v2 = vadd.f32 %v827_v1, %v181_v61  ;;  %v2409_v3 = vpop.f32.mrb[7].mxu1  ;;  %v2200_v1 = vld [vmem:[%s3276_s1 + $0x8] sm:$0xff] }
 0xe97   :  { %v191_v3 = vadd.f32 %v2967_v62, %v2913_v13 }
 0xe98   :  { %2690 = vtanh.f32 %v831_v2  ;;  %v2186_v4 = vmul.f32 -1.442695, %v831_v2 }
 0xe9a   :  { %2692 = vpow2.f32 %v2186_v4 }
 0xea2   :  { %v2691_v5 = vpop.eup %2690 }
 0xea3   :  { %841 = vrot.lane.b32.xlu1 %v2691_v5, %s2781_s29 }
 0xea4   :  { %v2693_v6 = vpop.eup %2692 }
 0xea5   :  { %v835_v7 = vadd.f32 1.0, %v2693_v6 }
 0xea7   :  { %2694 = vrcp.f32 %v835_v7  ;;  %v3112_v7 = vld [vmem:[%s3281_s8] ss:$0 sm:$0xff] }
 0xeb1   :  { %v2695_v9 = vpop.eup %2694 }
 0xeb2   :  { %v839_v12 = vmul.f32 %v2695_v9, %v740_v55  ;;  %v1250_v55 = vld [vmem:[%s3280_s7 + $0x18] sm:$0xff] }
 0xeb3   :  { %v3079_v56 = vpack.c.bf16 %v1250_v55, %v1249_v54 }
 0xf15   :  { %v842_v11 = vpop.permute.xlu1 %841 }
 0xf16   :  { %v844_v10 = vmul.f32 %v2695_v9, %v842_v11 }
 0xf18   :  { %846 = vrot.lane.b32.xlu0 %v844_v10, %s2781_s29 }
 0xf8a   :  { %v847_v14 = vpop.permute.xlu0 %846 }
 0xf8b   :  { %v849_v60 = vadd.f32 %v847_v14, %v839_v12 }
 0xf8d   :  { %2696 = vtanh.f32 %v849_v60 }
 0xf97   :  { %v2697_v18 = vpop.eup %2696 }
 0xf98   :  { %852 = vrot.lane.b32.xlu1 %v2697_v18, %s2781_s29 }
0x100a   :  { %v853_v19 = vpop.permute.xlu1 %852 }
0x100b   :  { %v855_v20 = vmul.f32 %v2695_v9, %v853_v19 }
0x100d   :  { %857 = vrot.lane.b32.xlu0 %v855_v20, %s2782_s5 }
0x107f   :  { %v858_v24 = vpop.permute.xlu0 %857 }
0x1080   :  { %861 = vst.msk [vmem:[#allocation3 + $0x28] sm:$0xff] %vm209_vm3, %v858_v24  ;;  %2419 = vmatmul.mubr.msk.f32.vlgmr.msra.gmra.mrb[12].mxu0 %vm209_vm3, %v858_v24 }
0x1081   :  { %2591 = vmatpush3.bf16.msra.mxu0 %v2588_v17  ;;  %2440 = vmatprep.mubr.msk.f32.mxu0 %vm209_vm3, %v1086_v25 }
0x1082   :  { %2593 = vmatprep.subr.bf16.mxu0 %v2592_v23 }
0x1085   :  { %2595 = vmatpush3.bf16.msra.mxu0 %v2592_v23 }
0x1086   :  { %2608 = vmatprep.subr.bf16.mxu0 %v2778_v0 }
0x1087   :  { %v1091_v30 = vld [vmem:[#allocation3 + $0x28] sm:$0xff] }
0x1088   :  { %2441 = vmatmul.mubr.msk.f32.vlgmr.msra.gmra.mrb[14].mxu0 %vm209_vm3, %v1087_v26 }
0x1089   :  { %2443 = vmatprep.mubr.msk.f32.mxu0 %vm209_vm3, %v1088_v27  ;;  %2610 = vmatpush3.bf16.msra.mxu0 %v3069_v53 }
0x108a   :  { %2611 = vmatprep.subr.bf16.mxu0 %v2778_v0 }
0x108c   :  { %2444 = vmatmul.mubr.msk.f32.gmra.mrb[16].mxu0 %vm209_vm3, %v1089_v28 }
0x108d   :  { %2446 = vmatprep.mubr.msk.f32.mxu0 %vm209_vm3, %v1090_v29  ;;  %2613 = vmatpush3.bf16.msra.mxu0 %v3079_v56 }
0x108e   :  { %2620 = vmatprep.subr.bf16.mxu0 %v2778_v0 }
0x1090   :  { %2447 = vmatmul.mubr.msk.f32.gmra.mrb[18].mxu0 %vm209_vm3, %v1091_v30 }
0x1153   :  { %v936_v32 = vpop.f32.mrb[12].mxu0 }
0x1154   :  { %v940_v33 = vadd.f32 %v936_v32, %v186_v31  ;;  %v2420_v34 = vpop.f32.mrb[13].mxu0 }
0x1156   :  { %2698 = vtanh.f32 %v940_v33  ;;  %v2188_v42 = vmul.f32 -1.442695, %v940_v33 }
0x1158   :  { %2700 = vpow2.f32 %v2188_v42 }
0x115b   :  { %v3047_v35 = vpop.f32.mrb[14].mxu0 }
0x115c   :  { %v1195_v36 = vpop.f32.mrb[15].mxu0 }
0x115d   :  { %v1196_v9 = vadd.f32 %v3112_v7, %v1195_v36 }
0x115f   :  { %v3049_v37 = vpop.f32.mrb[16].mxu0 }
0x1160   :  { %v2699_v38 = vpop.eup %2698  ;;  %v3051_v39 = vpop.f32.mrb[17].mxu0 }
0x1161   :  { %950 = vrot.lane.b32.xlu1 %v2699_v38, %s2781_s29 }
0x1162   :  { %v2701_v63 = vpop.eup %2700 }
0x1163   :  { %v3054_v40 = vpop.f32.mrb[18].mxu0  ;;  %v944_v43 = vadd.f32 1.0, %v2701_v63 }
0x1164   :  { %v3056_v41 = vpop.f32.mrb[19].mxu0 }
0x1165   :  { %2702 = vrcp.f32 %v944_v43  ;;  %v1201_v43 = vadd.f32 %v3047_v35, %v3112_v7 }
0x116f   :  { %v2703_v44 = vpop.eup %2702 }
0x1170   :  { %v948_v47 = vmul.f32 %v2703_v44, %v849_v60 }
0x11d3   :  { %v951_v45 = vpop.permute.xlu1 %950 }
0x11d4   :  { %v953_v46 = vmul.f32 %v2703_v44, %v951_v45 }
0x11d6   :  { %955 = vrot.lane.b32.xlu0 %v953_v46, %s2781_s29 }
0x1248   :  { %v956_v48 = vpop.permute.xlu0 %955 }
0x1249   :  { %v3059_v49 = vadd.f32 %v956_v48, %v948_v47 }
0x124b   :  { %2704 = vtanh.f32 %v3059_v49 }
0x1255   :  { %v2705_v50 = vpop.eup %2704 }
0x1256   :  { %961 = vrot.lane.b32.xlu1 %v2705_v50, %s2781_s29 }
0x12c8   :  { %v962_v57 = vpop.permute.xlu1 %961 }
0x12c9   :  { %v964_v58 = vmul.f32 %v2703_v44, %v962_v57 }
0x12cb   :  { %966 = vrot.lane.b32.xlu0 %v964_v58, %s2782_s5 }
0x12cf   :  { %1333 = vrot.lane.b32.xlu0 %v2201_v59, %s2781_s29 }
0x133d   :  { %v967_v61 = vpop.permute.xlu0 %966 }
0x133e   :  { %970 = vst.msk [vmem:[#allocation3 + $0x30] sm:$0xff] %vm209_vm3, %v967_v61  ;;  %2430 = vmatmul.mubr.msk.f32.vlgmr.msra.gmra.mrb[8].mxu1 %vm209_vm3, %v967_v61 }
0x133f   :  { %2598 = vmatpush3.bf16.msra.mxu1 %v3069_v53  ;;  %2460 = vmatprep.mubr.msk.f32.mxu1 %vm2779_vm2, %v2780_v8 }
0x1340   :  { %2599 = vmatprep.subr.bf16.mxu1 %v2778_v0 }
0x1341   :  { %v1334_v18 = vpop.permute.xlu0 %1333 }
0x1343   :  { %2601 = vmatpush3.bf16.msra.mxu1 %v3079_v56 }
0x1344   :  { %2602 = vmatprep.subr.bf16.mxu1 %v2778_v0 }
0x1345   :  { %v1092_v2 = vld [vmem:[#allocation3 + $0x30] sm:$0xff] }
0x1346   :  { %2461 = vmatmul.mubr.msk.f32.vlgmr.msra.gmra.mrb[10].mxu1 %vm209_vm3, %v2200_v1  ;;  %2449 = vmatprep.mubr.msk.f32.mxu0 %vm209_vm3, %v1092_v2 }
0x1347   :  { %2604 = vmatpush3.bf16.msra.mxu1 %v3069_v53  ;;  %2471 = vmatprep.mubr.msk.f32.mxu1 %vm2779_vm2, %v2780_v8 }
0x1348   :  { %2605 = vmatprep.subr.bf16.mxu1 %v2778_v0 }
0x134b   :  { %2607 = vmatpush3.bf16.msra.mxu1 %v3079_v56 }
0x134c   :  { %2614 = vmatprep.subr.bf16.mxu1 %v2778_v0 }
0x1411   :  { %v1045_v5 = vpop.f32.mrb[8].mxu1 }
0x1412   :  { %v1049_v4 = vadd.f32 %v1045_v5, %v191_v3  ;;  %v2431_v6 = vpop.f32.mrb[9].mxu1 }
0x1413   :  { %v1206_v6 = vadd.f32 %v3112_v7, %v3051_v39 }
0x1414   :  { %v2190_v24 = vmul.f32 -1.442695, %v1049_v4 }
0x1419   :  { %v1320_v11 = vpop.f32.mrb[10].mxu1 }
0x141a   :  { %v1324_v10 = vadd.f32 %v1320_v11, %v1196_v9  ;;  %v2462_v12 = vpop.f32.mrb[11].mxu1 }
0x141c   :  { %2706 = vtanh.f32 %v1324_v10  ;;  %v2203_v60 = vmul.f32 -1.442695, %v1324_v10 }
0x141e   :  { %2708 = vpow2.f32 %v2203_v60 }
0x1426   :  { %v2707_v14 = vpop.eup %2706 }
0x1427   :  { %1338 = vrot.lane.b32.xlu1 %v2707_v14, %s2781_s29 }
0x1428   :  { %v2709_v13 = vpop.eup %2708 }
0x1429   :  { %v1328_v62 = vadd.f32 1.0, %v2709_v13 }
0x142b   :  { %2710 = vrcp.f32 %v1328_v62 }
0x1435   :  { %v2711_v15 = vpop.eup %2710 }
0x1436   :  { %v1336_v19 = vmul.f32 %v2711_v15, %v1334_v18 }
0x1499   :  { %v1339_v16 = vpop.permute.xlu1 %1338 }
0x149a   :  { %v1341_v17 = vmul.f32 %v2711_v15, %v1339_v16 }
0x149c   :  { %1343 = vrot.lane.b32.xlu1 %v1341_v17, %s2781_s29 }
0x150e   :  { %v1344_v20 = vpop.permute.xlu1 %1343 }
0x150f   :  { %v1346_v21 = vadd.f32 %v1344_v20, %v1336_v19 }
0x1511   :  { %2712 = vtanh.f32 %v1346_v21 }
0x1512   :  { %2714 = vtanh.f32 %v1049_v4 }
0x1513   :  { %2716 = vpow2.f32 %v2190_v24 }
0x151b   :  { %v2713_v22 = vpop.eup %2712 }
0x151c   :  { %1349 = vrot.lane.b32.xlu0 %v2713_v22, %s2781_s29  ;;  %v2715_v23 = vpop.eup %2714 }
0x151d   :  { %v2717_v25 = vpop.eup %2716 }
0x151e   :  { %v1053_v26 = vadd.f32 1.0, %v2717_v25 }
0x1520   :  { %1059 = vrot.lane.b32.xlu0 %v2715_v23, %s2781_s29  ;;  %2718 = vrcp.f32 %v1053_v26  ;;  %v1211_v23 = vadd.f32 %v3049_v37, %v3112_v7 }
0x152a   :  { %v2719_v29 = vpop.eup %2718 }
0x152b   :  { %v1057_v33 = vmul.f32 %v2719_v29, %v3059_v49 }
0x158e   :  { %v1350_v27 = vpop.permute.xlu0 %1349 }
0x158f   :  { %v1352_v28 = vmul.f32 %v2711_v15, %v1350_v27 }
0x1591   :  { %1354 = vrot.lane.b32.xlu1 %v1352_v28, %s2782_s5 }
0x1592   :  { %v1060_v30 = vpop.permute.xlu0 %1059 }
0x1593   :  { %v1062_v31 = vmul.f32 %v2719_v29, %v1060_v30 }
0x1595   :  { %1064 = vrot.lane.b32.xlu0 %v1062_v31, %s2781_s29 }
0x1603   :  { %v1355_v32 = vpop.permute.xlu1 %1354 }
0x1604   :  { %1357 = vst.msk [vmem:[%s3282_s11] sm:$0xff] %vm209_vm3, %v1355_v32  ;;  %2472 = vmatmul.mubr.msk.f32.vlgmr.msra.gmra.mrb[12].mxu1 %vm209_vm3, %v1355_v32 }
0x1605   :  { %2616 = vmatpush3.bf16.msra.mxu1 %v3069_v53  ;;  %2493 = vmatprep.mubr.msk.f32.mxu1 %vm2779_vm2, %v2780_v8 }
0x1606   :  { %2617 = vmatprep.subr.bf16.mxu1 %v2778_v0 }
0x1607   :  { %v1065_v34 = vpop.permute.xlu0 %1064 }
0x1608   :  { %v3131_v36 = vadd.f32 %v1065_v34, %v1057_v33 }
0x1609   :  { %2619 = vmatpush3.bf16.msra.mxu1 %v3079_v56 }
0x160a   :  { %2720 = vtanh.f32 %v3131_v36  ;;  %2626 = vmatprep.subr.bf16.mxu1 %v2778_v0 }
0x1614   :  { %v2721_v38 = vpop.eup %2720 }
0x1615   :  { %1070 = vrot.lane.b32.xlu0 %v2721_v38, %s2781_s29 }
0x1687   :  { %v1071_v42 = vpop.permute.xlu0 %1070 }
0x1688   :  { %v1073_v63 = vmul.f32 %v2719_v29, %v1071_v42 }
0x168a   :  { %1075 = vrot.lane.b32.xlu0 %v1073_v63, %s2782_s5 }
0x16d7   :  { %v1431_v44 = vpop.f32.mrb[12].mxu1 }
0x16d8   :  { %v1435_v45 = vadd.f32 %v1431_v44, %v1201_v43  ;;  %v2473_v46 = vpop.f32.mrb[13].mxu1 }
0x16da   :  { %2722 = vtanh.f32 %v1435_v45  ;;  %v2205_v35 = vmul.f32 -1.442695, %v1435_v45  ;;  %v1216_v45 = vadd.f32 %v3112_v7, %v3056_v41 }
0x16dc   :  { %2724 = vpow2.f32 %v2205_v35 }
0x16e4   :  { %v2723_v47 = vpop.eup %2722 }
0x16e5   :  { %1445 = vrot.lane.b32.xlu1 %v2723_v47, %s2781_s29 }
0x16e6   :  { %v2725_v50 = vpop.eup %2724 }
0x16e7   :  { %v1439_v51 = vadd.f32 1.0, %v2725_v50 }
0x16e9   :  { %2726 = vrcp.f32 %v1439_v51 }
0x16f3   :  { %v2727_v52 = vpop.eup %2726 }
0x16f4   :  { %v1443_v57 = vmul.f32 %v2727_v52, %v1346_v21 }
0x16fc   :  { %v1076_v48 = vpop.permute.xlu0 %1075 }
0x16fd   :  { %1079 = vst.msk [vmem:[#allocation3 + $0x38] sm:$0xff] %vm209_vm3, %v1076_v48  ;;  %1080 = vst.msk [vmem:[%s3283_s13] sm:$0xff] %vm209_vm3, %v1076_v48 }
0x1704   :  { %v1093_v49 = vld [vmem:[#allocation3 + $0x38] sm:$0xff] }
0x1705   :  { %2450 = vmatmul.mubr.msk.f32.gmra.mrb[20].mxu0 %vm209_vm3, %v1093_v49 }
0x1706   :  { %2482 = vmatprep.mubr.msk.f32.mxu0 %vm2779_vm2, %v2780_v8 }
0x1757   :  { %v1446_v54 = vpop.permute.xlu1 %1445 }
0x1758   :  { %v1448_v55 = vmul.f32 %v2727_v52, %v1446_v54 }
0x175a   :  { %1450 = vrot.lane.b32.xlu1 %v1448_v55, %s2781_s29 }
0x17cc   :  { %v1451_v58 = vpop.permute.xlu1 %1450 }
0x17cd   :  { %v1453_v59 = vadd.f32 %v1451_v58, %v1443_v57 }
0x17cf   :  { %2728 = vtanh.f32 %v1453_v59 }
0x17d8   :  { %v3150_v61 = vpop.f32.mrb[20].mxu0 }
0x17d9   :  { %v2729_v1 = vpop.eup %2728  ;;  %v3152_v2 = vpop.f32.mrb[21].mxu0 }
0x17da   :  { %1456 = vrot.lane.b32.xlu1 %v2729_v1, %s2781_s29 }
0x184c   :  { %v1457_v3 = vpop.permute.xlu1 %1456 }
0x184d   :  { %v1459_v5 = vmul.f32 %v2727_v52, %v1457_v3 }
0x184f   :  { %1461 = vrot.lane.b32.xlu1 %v1459_v5, %s2782_s5 }
0x18c1   :  { %v1462_v4 = vpop.permute.xlu1 %1461 }
0x18c2   :  { %2206 = vst.msk [vmem:[%s3282_s11 + $0x8] sm:$0xff] %vm209_vm3, %v1462_v4  ;;  %2483 = vmatmul.mubr.msk.f32.vlgmr.msra.gmra.mrb[22].mxu0 %vm209_vm3, %v1462_v4  ;;  %v1221_v4 = vadd.f32 %v3054_v40, %v3112_v7 }
0x18c3   :  { %2622 = vmatpush3.bf16.msra.mxu0 %v3069_v53  ;;  %2504 = vmatprep.mubr.msk.f32.mxu0 %vm2779_vm2, %v2780_v8 }
0x18c4   :  { %2623 = vmatprep.subr.bf16.mxu0 %v2778_v0 }
0x18c7   :  { %2625 = vmatpush3.bf16.msra.mxu0 %v3079_v56 }
0x18c8   :  { %2632 = vmatprep.subr.bf16.mxu0 %v2778_v0 }
0x1995   :  { %v1539_v9 = vpop.f32.mrb[22].mxu0 }
0x1996   :  { %v1543_v11 = vadd.f32 %v1539_v9, %v1206_v6  ;;  %v2484_v10 = vpop.f32.mrb[23].mxu0 }
0x1998   :  { %2730 = vtanh.f32 %v1543_v11  ;;  %v2208_v14 = vmul.f32 -1.442695, %v1543_v11 }
0x199a   :  { %2732 = vpow2.f32 %v2208_v14 }
0x19a2   :  { %v2731_v12 = vpop.eup %2730 }
0x19a3   :  { %1553 = vrot.lane.b32.xlu0 %v2731_v12, %s2781_s29 }
0x19a4   :  { %v2733_v60 = vpop.eup %2732 }
0x19a5   :  { %v1547_v13 = vadd.f32 1.0, %v2733_v60 }
0x19a7   :  { %2734 = vrcp.f32 %v1547_v13 }
0x19b1   :  { %v2735_v62 = vpop.eup %2734 }
0x19b2   :  { %v1551_v17 = vmul.f32 %v2735_v62, %v1453_v59 }
0x1a15   :  { %v1554_v15 = vpop.permute.xlu0 %1553 }
0x1a16   :  { %v1556_v16 = vmul.f32 %v2735_v62, %v1554_v15 }
0x1a18   :  { %1558 = vrot.lane.b32.xlu1 %v1556_v16, %s2781_s29 }
0x1a8a   :  { %v1559_v18 = vpop.permute.xlu1 %1558 }
0x1a8b   :  { %v1561_v39 = vadd.f32 %v1559_v18, %v1551_v17  ;;  %v1226_v18 = vadd.f32 %v3112_v7, %v3152_v2 }
0x1a8d   :  { %2736 = vtanh.f32 %v1561_v39 }
0x1a97   :  { %v2737_v19 = vpop.eup %2736 }
0x1a98   :  { %1564 = vrot.lane.b32.xlu0 %v2737_v19, %s2781_s29 }
0x1b0a   :  { %v1565_v20 = vpop.permute.xlu0 %1564 }
0x1b0b   :  { %v1567_v21 = vmul.f32 %v2735_v62, %v1565_v20 }
0x1b0d   :  { %1569 = vrot.lane.b32.xlu1 %v1567_v21, %s2782_s5 }
0x1b7f   :  { %v1570_v22 = vpop.permute.xlu1 %1569 }
0x1b80   :  { %2209 = vst.msk [vmem:[%s3282_s11 + $0x10] sm:$0xff] %vm209_vm3, %v1570_v22  ;;  %2494 = vmatmul.mubr.msk.f32.vlgmr.msra.gmra.mrb[14].mxu1 %vm209_vm3, %v1570_v22 }
0x1b81   :  { %2628 = vmatpush3.bf16.msra.mxu1 %v3069_v53  ;;  %2515 = vmatprep.mubr.msk.f32.mxu1 %vm2779_vm2, %v2780_v8 }
0x1b82   :  { %2629 = vmatprep.subr.bf16.mxu1 %v2778_v0 }
0x1b85   :  { %2631 = vmatpush3.bf16.msra.mxu1 %v3079_v56 }
0x1b86   :  { %2638 = vmatprep.subr.bf16.mxu1 %v2778_v0 }
0x1c53   :  { %v1647_v24 = vpop.f32.mrb[14].mxu1 }
0x1c54   :  { %v1651_v25 = vadd.f32 %v1647_v24, %v1211_v23  ;;  %v2495_v26 = vpop.f32.mrb[15].mxu1 }
0x1c56   :  { %2738 = vtanh.f32 %v1651_v25  ;;  %v2211_v28 = vmul.f32 -1.442695, %v1651_v25 }
0x1c58   :  { %2740 = vpow2.f32 %v2211_v28 }
0x1c60   :  { %v2739_v27 = vpop.eup %2738 }
0x1c61   :  { %1661 = vrot.lane.b32.xlu0 %v2739_v27, %s2781_s29 }
0x1c62   :  { %v2741_v29 = vpop.eup %2740 }
0x1c63   :  { %v1655_v30 = vadd.f32 1.0, %v2741_v29 }
0x1c65   :  { %2742 = vrcp.f32 %v1655_v30 }
0x1c6f   :  { %v2743_v31 = vpop.eup %2742 }
0x1c70   :  { %v1659_v34 = vmul.f32 %v2743_v31, %v1561_v39 }
0x1cd3   :  { %v1662_v32 = vpop.permute.xlu0 %1661 }
0x1cd4   :  { %v1664_v33 = vmul.f32 %v2743_v31, %v1662_v32 }
0x1cd6   :  { %1666 = vrot.lane.b32.xlu1 %v1664_v33, %s2781_s29 }
0x1d48   :  { %v1667_v38 = vpop.permute.xlu1 %1666 }
0x1d49   :  { %v1669_v37 = vadd.f32 %v1667_v38, %v1659_v34  ;;  %v1231_v34 = vadd.f32 %v3150_v61, %v3112_v7  ;;  %v2227_v7 = vld [vmem:[%s3284_s9] ss:$0 sm:$0xff]  ;;  %s2783_s9 = smov 96  }
0x1d4b   :  { %2744 = vtanh.f32 %v1669_v37 }
0x1d55   :  { %v2745_v42 = vpop.eup %2744 }
0x1d56   :  { %1672 = vrot.lane.b32.xlu0 %v2745_v42, %s2781_s29 }
0x1dc8   :  { %v1673_v63 = vpop.permute.xlu0 %1672 }
0x1dc9   :  { %v1675_v43 = vmul.f32 %v2743_v31, %v1673_v63 }
0x1dcb   :  { %1677 = vrot.lane.b32.xlu1 %v1675_v43, %s2782_s5 }
0x1e3d   :  { %v1678_v44 = vpop.permute.xlu1 %1677 }
0x1e3e   :  { %2212 = vst.msk [vmem:[%s3282_s11 + $0x18] sm:$0xff] %vm209_vm3, %v1678_v44  ;;  %2505 = vmatmul.mubr.msk.f32.vlgmr.msra.gmra.mrb[24].mxu0 %vm209_vm3, %v1678_v44 }
0x1e3f   :  { %2634 = vmatpush3.bf16.msra.mxu0 %v3069_v53  ;;  %2526 = vmatprep.mubr.msk.f32.mxu0 %vm2779_vm2, %v2780_v8 }
0x1e40   :  { %2635 = vmatprep.subr.bf16.mxu0 %v2778_v0 }
0x1e43   :  { %2637 = vmatpush3.bf16.msra.mxu0 %v3079_v56 }
0x1f11   :  { %v1755_v46 = vpop.f32.mrb[24].mxu0 }
0x1f12   :  { %v1759_v47 = vadd.f32 %v1755_v46, %v1216_v45  ;;  %v2506_v48 = vpop.f32.mrb[25].mxu0 }
0x1f14   :  { %2746 = vtanh.f32 %v1759_v47  ;;  %v2214_v35 = vmul.f32 -1.442695, %v1759_v47 }
0x1f16   :  { %2748 = vpow2.f32 %v2214_v35 }
0x1f1e   :  { %v2747_v49 = vpop.eup %2746 }
0x1f1f   :  { %1769 = vrot.lane.b32.xlu0 %v2747_v49, %s2781_s29 }
0x1f20   :  { %v2749_v50 = vpop.eup %2748 }
0x1f21   :  { %v1763_v51 = vadd.f32 1.0, %v2749_v50 }
0x1f23   :  { %2750 = vrcp.f32 %v1763_v51 }
0x1f2d   :  { %v2751_v52 = vpop.eup %2750 }
0x1f2e   :  { %v1767_v57 = vmul.f32 %v2751_v52, %v1669_v37 }
0x1f91   :  { %v1770_v54 = vpop.permute.xlu0 %1769 }
0x1f92   :  { %v1772_v55 = vmul.f32 %v2751_v52, %v1770_v54 }
0x1f94   :  { %1774 = vrot.lane.b32.xlu1 %v1772_v55, %s2781_s29 }
0x2006   :  { %v1775_v58 = vpop.permute.xlu1 %1774 }
0x2007   :  { %v1777_v41 = vadd.f32 %v1775_v58, %v1767_v57  ;;  %v20_v57 = vstv %s3285_s10 }
0x2008   :  { %21 = vst [vmem:[#allocation4] sm:$0x1] %v20_v57 }
0x2009   :  { %2752 = vtanh.f32 %v1777_v41 }
0x2013   :  { %v2753_v59 = vpop.eup %2752 }
0x2014   :  { %1780 = vrot.lane.b32.xlu0 %v2753_v59, %s2781_s29 }
0x2086   :  { %v1781_v1 = vpop.permute.xlu0 %1780 }
0x2087   :  { %v1783_v3 = vmul.f32 %v2751_v52, %v1781_v1 }
0x2089   :  { %1785 = vrot.lane.b32.xlu1 %v1783_v3, %s2782_s5  ;;  %v2228_v3 = vld [vmem:[#allocation4] ss:$0 sm:$0xff] }
0x20fb   :  { %v1786_v5 = vpop.permute.xlu1 %1785 }
0x20fc   :  { %2215 = vst.msk [vmem:[%s3282_s11 + $0x20] sm:$0xff] %vm209_vm3, %v1786_v5  ;;  %2516 = vmatmul.mubr.msk.f32.vlgmr.msra.gmra.mrb[16].mxu1 %vm209_vm3, %v1786_v5 }
0x20fd   :  { %2640 = vmatpush3.bf16.msra.mxu1 %v3069_v53  ;;  %2537 = vmatprep.mubr.msk.f32.mxu1 %vm2779_vm2, %v2780_v8 }
0x20fe   :  { %2641 = vmatprep.subr.bf16.mxu1 %v2778_v0 }
0x2101   :  { %2643 = vmatpush3.bf16.msra.mxu1 %v3079_v56 }
0x21cf   :  { %v1863_v6 = vpop.f32.mrb[16].mxu1 }
0x21d0   :  { %v1867_v9 = vadd.f32 %v1863_v6, %v1221_v4  ;;  %v2517_v11 = vpop.f32.mrb[17].mxu1 }
0x21d2   :  { %2754 = vtanh.f32 %v1867_v9  ;;  %v2217_v12 = vmul.f32 -1.442695, %v1867_v9 }
0x21d4   :  { %2756 = vpow2.f32 %v2217_v12 }
0x21dc   :  { %v2755_v10 = vpop.eup %2754 }
0x21dd   :  { %1877 = vrot.lane.b32.xlu0 %v2755_v10, %s2781_s29 }
0x21de   :  { %v2757_v53 = vpop.eup %2756 }
0x21df   :  { %v1871_v14 = vadd.f32 1.0, %v2757_v53 }
0x21e1   :  { %2758 = vrcp.f32 %v1871_v14 }
0x21eb   :  { %v2759_v8 = vpop.eup %2758 }
0x21ec   :  { %v1875_v56 = vmul.f32 %v2759_v8, %v1777_v41 }
0x224f   :  { %v1878_v60 = vpop.permute.xlu0 %1877 }
0x2250   :  { %v1880_v0 = vmul.f32 %v2759_v8, %v1878_v60 }
0x2252   :  { %1882 = vrot.lane.b32.xlu1 %v1880_v0, %s2781_s29 }
0x22c4   :  { %v1883_v13 = vpop.permute.xlu1 %1882 }
0x22c5   :  { %v1885_v40 = vadd.f32 %v1883_v13, %v1875_v56 }
0x22c7   :  { %2760 = vtanh.f32 %v1885_v40 }
0x22d1   :  { %v2761_v62 = vpop.eup %2760 }
0x22d2   :  { %1888 = vrot.lane.b32.xlu0 %v2761_v62, %s2781_s29 }
0x2344   :  { %v1889_v15 = vpop.permute.xlu0 %1888 }
0x2345   :  { %v1891_v16 = vmul.f32 %v2759_v8, %v1889_v15 }
0x2347   :  { %1893 = vrot.lane.b32.xlu1 %v1891_v16, %s2782_s5 }
0x23b9   :  { %v1894_v17 = vpop.permute.xlu1 %1893 }
0x23ba   :  { %2218 = vst.msk [vmem:[%s3282_s11 + $0x28] sm:$0xff] %vm209_vm3, %v1894_v17  ;;  %2527 = vmatmul.mubr.msk.f32.vlgmr.msra.gmra.mrb[26].mxu0 %vm209_vm3, %v1894_v17 }
0x248d   :  { %v1971_v39 = vpop.f32.mrb[26].mxu0 }
0x248e   :  { %v1975_v19 = vadd.f32 %v1971_v39, %v1226_v18  ;;  %v2528_v20 = vpop.f32.mrb[27].mxu0 }
0x2490   :  { %2762 = vtanh.f32 %v1975_v19  ;;  %v2220_v22 = vmul.f32 -1.442695, %v1975_v19 }
0x2492   :  { %2764 = vpow2.f32 %v2220_v22 }
0x249a   :  { %v2763_v21 = vpop.eup %2762 }
0x249b   :  { %1985 = vrot.lane.b32.xlu0 %v2763_v21, %s2781_s29 }
0x249c   :  { %v2765_v23 = vpop.eup %2764 }
0x249d   :  { %v1979_v24 = vadd.f32 1.0, %v2765_v23 }
0x249f   :  { %2766 = vrcp.f32 %v1979_v24 }
0x24a9   :  { %v2767_v25 = vpop.eup %2766 }
0x24aa   :  { %v1983_v28 = vmul.f32 %v2767_v25, %v1885_v40 }
0x250d   :  { %v1986_v26 = vpop.permute.xlu0 %1985 }
0x250e   :  { %v1988_v27 = vmul.f32 %v2767_v25, %v1986_v26 }
0x2510   :  { %1990 = vrot.lane.b32.xlu1 %v1988_v27, %s2781_s29 }
0x2582   :  { %v1991_v29 = vpop.permute.xlu1 %1990 }
0x2583   :  { %v1993_v2 = vadd.f32 %v1991_v29, %v1983_v28 }
0x2585   :  { %2768 = vtanh.f32 %v1993_v2 }
0x258f   :  { %v2769_v30 = vpop.eup %2768 }
0x2590   :  { %1996 = vrot.lane.b32.xlu0 %v2769_v30, %s2781_s29 }
0x2602   :  { %v1997_v31 = vpop.permute.xlu0 %1996 }
0x2603   :  { %v1999_v32 = vmul.f32 %v2767_v25, %v1997_v31 }
0x2605   :  { %2001 = vrot.lane.b32.xlu1 %v1999_v32, %s2782_s5 }
0x2677   :  { %v2002_v33 = vpop.permute.xlu1 %2001 }
0x2678   :  { %2221 = vst.msk [vmem:[%s3282_s11 + $0x30] sm:$0xff] %vm209_vm3, %v2002_v33  ;;  %2538 = vmatmul.mubr.msk.f32.vlgmr.msra.gmra.mrb[18].mxu1 %vm209_vm3, %v2002_v33 }
0x274b   :  { %v2079_v38 = vpop.f32.mrb[18].mxu1 }
0x274c   :  { %v2083_v37 = vadd.f32 %v2079_v38, %v1231_v34  ;;  %v2539_v42 = vpop.f32.mrb[19].mxu1 }
0x274e   :  { %2770 = vtanh.f32 %v2083_v37  ;;  %v2223_v43 = vmul.f32 -1.442695, %v2083_v37 }
0x2750   :  { %2772 = vpow2.f32 %v2223_v43 }
0x2758   :  { %v2771_v63 = vpop.eup %2770 }
0x2759   :  { %2093 = vrot.lane.b32.xlu0 %v2771_v63, %s2781_s29 }
0x275a   :  { %v2773_v44 = vpop.eup %2772 }
0x275b   :  { %v2087_v45 = vadd.f32 1.0, %v2773_v44 }
0x275d   :  { %2774 = vrcp.f32 %v2087_v45 }
0x2767   :  { %v2775_v46 = vpop.eup %2774 }
0x2768   :  { %v2091_v61 = vmul.f32 %v2775_v46, %v1993_v2 }
0x27cb   :  { %v2094_v47 = vpop.permute.xlu0 %2093 }
0x27cc   :  { %v2096_v48 = vmul.f32 %v2775_v46, %v2094_v47 }
0x27ce   :  { %2098 = vrot.lane.b32.xlu1 %v2096_v48, %s2781_s29 }
0x27d2   :  { %2128 = vrot.lane.b32.xlu1 %v2227_v7, %s2782_s5 }
0x2840   :  { %v2099_v49 = vpop.permute.xlu1 %2098 }
0x2841   :  { %v2101_v35 = vadd.f32 %v2099_v49, %v2091_v61 }
0x2843   :  { %2776 = vtanh.f32 %v2101_v35 }
0x2844   :  { %v2129_v52 = vpop.permute.xlu1 %2128 }
0x284d   :  { %v2777_v50 = vpop.eup %2776 }
0x284e   :  { %2104 = vrot.lane.b32.xlu0 %v2777_v50, %s2781_s29 }
0x28c0   :  { %v2105_v51 = vpop.permute.xlu0 %2104 }
0x28c1   :  { %v2107_v54 = vmul.f32 %v2775_v46, %v2105_v51 }
0x28c3   :  { %v2131_v55 = vmul.f32 %v2129_v52, %v2107_v54 }
0x28c5   :  { %2133 = vrot.lane.b32.xlu0 %v2131_v55, %s2782_s5 }
0x28c9   :  { %1082 = vrot.lane.b32.xlu0 %v3131_v36, %s2783_s9 }
0x28cd   :  { %2109 = vrot.lane.b32.xlu0 %v2107_v54, %s2782_s5 }
0x28d1   :  { %2117 = vrot.lane.b32.xlu0 %v2101_v35, %s2783_s9 }
0x2937   :  { %v2134_v58 = vpop.permute.xlu0 %2133 }
0x2938   :  { %v2136_v41 = vsel %vm209_vm3, %v2134_v58, 0.0 }
0x2939   :  { %2137 = vadd.xlane.f32.xlu1 %v2136_v41 }
0x293b   :  { %v1083_v59 = vpop.permute.xlu0 %1082 }
0x293c   :  { %1085 = vst.msk [vmem:[%s3286_s14] sm:$0xff] %vm209_vm3, %v1083_v59 }
0x293f   :  { %v2110_v1 = vpop.permute.xlu0 %2109 }
0x2940   :  { %2224 = vst.msk [vmem:[%s3282_s11 + $0x38] sm:$0xff] %vm209_vm3, %v2110_v1  ;;  %2225 = vst.msk [vmem:[%s3283_s13 + $0x8] sm:$0xff] %vm209_vm3, %v2110_v1 }
0x2943   :  { %v2118_v36 = vpop.permute.xlu0 %2117 }
0x2944   :  { %2226 = vst.msk [vmem:[%s3286_s14 + $0x8] sm:$0xff] %vm209_vm3, %v2118_v36 }
0x29c6   :  { %v2138_v5 = vpop.xlane.xlu1 %2137 }
0x29c7   :  { %v2146_v4 = vadd.f32 %v2228_v3, %v2138_v5 }
0x29c9   :  { %2148 = vst.msk [vmem:[%s3287_s12] sm:$0xff] %vm2147_vm4, %v2146_v4 }

</bundles_post_ra>
